<compile_context>
chip_gen: v7x
topology: tpu7x:2x2x1
jax: 0.10.0
libtpu: 0.0.40
codegen_flags: <defaults>
</compile_context>

<pallas_src>
import functools

import jax
import jax.numpy as jnp
from jax.experimental import pallas as pl
from jax.experimental.pallas import tpu as pltpu

EPS = 1e-5        # nn.BatchNorm1d default eps
NCH = 16          # hidden channels of every SP_conv layer
PARAM_ROWS = 96   # rows of the slab holding weights/BN/head; pool matrix starts here


def sp1d_kernel(x_ref, p_ref, out_ref, *, batch, seq_len, n_pad, out_ch):
    """SP_1D forward for the whole (small) batch in one grid point.

    x_ref:   (1, n_pad)             flattened center-pixel spectra (batch-major), 0-padded
    p_ref:   (PARAM_ROWS+n_pad,128) packed parameter slab:
               rows 0:16   cols 0:3    layer-1 conv taps  [prev | center | next] columns
               rows 0:16   cols 8:18   BN gamma/beta      col 8+2l = gamma_l, 9+2l = beta_l
               rows 16:80  cols 0:48   layers 2..5 taps   layer i at rows 16+16i:32+16i,
                                                          cols [0:16]=prev [16:32]=c [32:48]=next
               rows 80:80+out_ch      cols 0:16 head weight, col 16 head bias
               rows 96:96+n_pad        GAP pool matrix (n_pad, 128)
    out_ref: (out_ch, 128)           lane-dense logits; real batch in cols [0:batch]
    """
    bl = batch * seq_len
    inv_bl = 1.0 / bl
    f32 = jnp.float32

    # ---- hoisted setup: lane bookkeeping, roll-convention probe, masks --------------
    lane = jax.lax.broadcasted_iota(jnp.int32, (1, n_pad), 1)
    pos = lane % seq_len

    # Probe pltpu.roll's shift convention once (robust to either direction convention):
    # f == 1.0  <=>  roll(v, 1)[i] == v[i-1]  (jnp.roll convention).
    probe = pltpu.roll(lane, 1, axis=1)
    f = (probe[:, 1:2] == 0).astype(f32)          # (1, 1)
    g = 1.0 - f

    not_first = (pos != 0).astype(f32)            # valid "prev" tap positions
    not_last = (pos != seq_len - 1).astype(f32)   # valid "next" tap positions
    valid = (lane < bl).astype(f32)               # real (non-padding) columns

    # masks applied to roll(h, 1) and roll(h, n_pad-1) respectively
    mask_p1 = f * not_first + g * not_last        # (1, n_pad)
    mask_m1 = f * not_last + g * not_first
    mask_p = jnp.broadcast_to(mask_p1, (NCH, n_pad))   # pre-broadcast once (no per-layer
    mask_m = jnp.broadcast_to(mask_m1, (NCH, n_pad))   # broadcast_in_dim re-emission)
    valid16 = jnp.broadcast_to(valid, (NCH, n_pad))

    def bn_relu(y, layer):
        # Training-mode BatchNorm1d: batch stats over the bl real columns, biased var,
        # one-pass moments + fused scale/shift.
        gamma = p_ref[0:16, 8 + 2 * layer: 9 + 2 * layer]     # (16, 1)
        beta = p_ref[0:16, 9 + 2 * layer:10 + 2 * layer]
        yv = y * valid16
        s1 = jnp.sum(yv, axis=1, keepdims=True)
        s2 = jnp.sum(yv * y, axis=1, keepdims=True)
        mu = s1 * inv_bl
        var = jnp.maximum(s2 * inv_bl - mu * mu, 0.0)
        scale = gamma * jax.lax.rsqrt(var + EPS)
        shift = beta - mu * scale
        return jnp.maximum(y * scale + shift, 0.0)

    # ---- layer 1: Cin = 1 -> 16, via outer products (degenerate K=1 matmul) ---------
    x = x_ref[...].astype(f32)                               # (1, n_pad)
    x_p = pltpu.roll(x, 1, axis=1) * mask_p1
    x_m = pltpu.roll(x, n_pad - 1, axis=1) * mask_m1
    w1 = p_ref[0:16, 0:3]                                    # [prev | center | next] cols
    w1_p = f * w1[:, 0:1] + g * w1[:, 2:3]                   # weight paired with x_p
    w1_m = f * w1[:, 2:3] + g * w1[:, 0:1]                   # weight paired with x_m
    w1_c = w1[:, 1:2]
    h = bn_relu(w1_c * x + w1_p * x_p + w1_m * x_m, 0)       # (16, n_pad)

    # Conv biases are dropped everywhere: they cancel exactly against the training-mode
    # BatchNorm mean subtraction.

    # ---- layers 2..5: 16 -> 16, three accumulated (16,16)@(16,N) MXU dots -----------
    for i in range(4):
        blk = p_ref[16 + 16 * i: 32 + 16 * i, 0:48]          # (16, 48)
        w_prev, w_c, w_next = blk[:, 0:16], blk[:, 16:32], blk[:, 32:48]
        w_p = f * w_prev + g * w_next                        # weight paired with roll(+1)
        w_m = f * w_next + g * w_prev                        # weight paired with roll(-1)
        h_p = pltpu.roll(h, 1, axis=1) * mask_p
        h_m = pltpu.roll(h, n_pad - 1, axis=1) * mask_m
        y = (jnp.dot(w_c, h, preferred_element_type=f32)
             + jnp.dot(w_p, h_p, preferred_element_type=f32)
             + jnp.dot(w_m, h_m, preferred_element_type=f32))
        h = bn_relu(y, i + 1)

    # ---- side-out head: GAP over the spectral axis (lane-dense pool matmul) then
    #      16 -> out_ch linear.  Output block is (out_ch, 128) lane-dense.
    pool = p_ref[PARAM_ROWS: PARAM_ROWS + n_pad, :]          # (n_pad, 128)
    pooled = jnp.dot(h, pool, preferred_element_type=f32)    # (16, 128)
    ws = p_ref[80: 80 + out_ch, 0:16]
    bs = p_ref[80: 80 + out_ch, 16:17]
    out = jnp.dot(ws, pooled, preferred_element_type=f32) + bs
    out_ref[...] = out.astype(out_ref.dtype)


def init_params(key, out_channels=9):
    ks = jax.random.split(key, 8)
    return {
        # fused conv weights: w[o, k*Cin + i] == torch Conv1d weight[o, i, k]
        "w1": jax.random.normal(ks[0], (16, 3), jnp.float32) * 0.3,
        "wr": jax.random.normal(ks[1], (4, 16, 48), jnp.float32) * 0.15,
        # BN affine: gb[layer, ch, 0] = gamma, gb[layer, ch, 1] = beta
        "gb": jnp.stack(
            [1.0 + 0.1 * jax.random.normal(ks[2], (5, 16), jnp.float32),
             0.1 * jax.random.normal(ks[3], (5, 16), jnp.float32)], axis=-1),
        # side-out head (16 -> out_channels), stored transposed for the kernel
        "ws_t": jax.random.normal(ks[4], (out_channels, 16), jnp.float32) * 0.2,
        "bs": jax.random.normal(ks[5], (out_channels, 1), jnp.float32) * 0.05,
        # conv biases: reference-only -- they cancel exactly against training-mode BN
        # mean subtraction, so the kernel never sees them.
        "b1": jax.random.normal(ks[6], (16,), jnp.float32) * 0.05,
        "br": jax.random.normal(ks[7], (4, 16), jnp.float32) * 0.05,
    }


def _pack_slab(params, seq_len, bl, n_pad):
    """Pack every parameter + the GAP pool matrix into one (PARAM_ROWS+n_pad, 128) slab."""
    out_ch = params["ws_t"].shape[0]
    assert out_ch <= 16, "head rows must fit before the pool block"
    slab = jnp.zeros((PARAM_ROWS + n_pad, 128), jnp.float32)
    slab = slab.at[0:16, 0:3].set(params["w1"])
    gb_cols = jnp.transpose(params["gb"], (1, 0, 2)).reshape(16, 10)   # col 2l=gamma,2l+1=beta
    slab = slab.at[0:16, 8:18].set(gb_cols)
    slab = slab.at[16:80, 0:48].set(params["wr"].reshape(64, 48))
    slab = slab.at[80:80 + out_ch, 0:16].set(params["ws_t"])
    slab = slab.at[80:80 + out_ch, 16:17].set(params["bs"])
    j = jnp.arange(n_pad)[:, None]
    s = jnp.arange(128)[None, :]
    pool = jnp.where((j // seq_len == s) & (j < bl), 1.0 / seq_len, 0.0).astype(jnp.float32)
    slab = slab.at[PARAM_ROWS:PARAM_ROWS + n_pad, :].set(pool)
    return slab


def sp_1d_forward(x, params):
    """x: NCHW (b, c, h, w). Returns [logits] with logits (b, out_channels)."""
    b, c, h, w = x.shape
    assert b <= 128, "batch rides on output lanes; tile the batch for b > 128"
    x_ct = x[:, :, h // 2, w // 2]                              # center_pixel(x) -> (b, c)
    bl = b * c
    n_pad = max(128, ((bl + 127) // 128) * 128)                 # lane-dense roll width
    x_row = x_ct.reshape(1, bl).astype(jnp.float32)             # batch-major spectra on lanes
    x_row = jnp.pad(x_row, ((0, 0), (0, n_pad - bl)))
    out_ch = params["ws_t"].shape[0]
    slab = _pack_slab(params, c, bl, n_pad)

    kernel = functools.partial(sp1d_kernel, batch=b, seq_len=c, n_pad=n_pad, out_ch=out_ch)
    vmem = pl.BlockSpec(memory_space=pltpu.MemorySpace.VMEM)
    out_pad = pl.pallas_call(
        kernel,
        out_shape=jax.ShapeDtypeStruct((out_ch, 128), jnp.float32),   # lane-dense output
        in_specs=[vmem, vmem],
        out_specs=vmem,
    )(x_row, slab)
    return [out_pad[:, :b].T]                                   # (b, out_channels)


def reference_forward(x, params):
    """Pure-JAX reference mirroring the PyTorch forward (train-mode BN, with conv biases)."""
    b, c, h, w = x.shape
    xs = x[:, :, h // 2, w // 2].reshape(b, 1, c).astype(jnp.float32)   # (b, Cin, L)

    def conv_bn_relu(hh, wf, bias, gamma, beta):
        cout, cin = wf.shape[0], hh.shape[1]
        wk = wf.reshape(cout, 3, cin)                           # [o, k, i]
        pad = jnp.pad(hh, ((0, 0), (0, 0), (1, 1)))
        y = sum(jnp.einsum("oi,bil->bol", wk[:, k, :], pad[:, :, k:k + c])
                for k in range(3))
        y = y + bias.reshape(1, -1, 1)
        mean = jnp.mean(y, axis=(0, 2), keepdims=True)
        var = jnp.mean((y - mean) ** 2, axis=(0, 2), keepdims=True)
        y = (y - mean) * jax.lax.rsqrt(var + EPS) * gamma.reshape(1, -1, 1) \
            + beta.reshape(1, -1, 1)
        return jnp.maximum(y, 0.0)

    hh = conv_bn_relu(xs, params["w1"], params["b1"],
                      params["gb"][0, :, 0], params["gb"][0, :, 1])
    for i in range(4):
        hh = conv_bn_relu(hh, params["wr"][i], params["br"][i],
                          params["gb"][i + 1, :, 0], params["gb"][i + 1, :, 1])
    pooled = jnp.mean(hh, axis=2)                               # (b, 16)
    return pooled @ params["ws_t"].T + params["bs"][:, 0]


if __name__ == "__main__":
    key = jax.random.PRNGKey(0)
    k_x, k_p = jax.random.split(key)

    # Small hyperspectral patch: batch=2, spectral bands c=16, spatial patch 7x7.
    b, c, hh, ww = 2, 16, 7, 7
    out_channels = 9
    x = jax.random.normal(k_x, (b, c, hh, ww), jnp.float32)
    params = init_params(k_p, out_channels=out_channels)

    out = sp_1d_forward(x, params)[0]
    out = jax.block_until_ready(out)
    ref = reference_forward(x, params)

    assert out.shape == (b, out_channels), out.shape
    assert jnp.allclose(out, ref, rtol=1e-2, atol=1e-2), (out, ref)
    print("KERNEL_OK")
</pallas_src>

<mosaic_0001>
module attributes {stable_mosaic.version = 11 : i64} {
  func.func @sp1d_kernel(%arg0: memref<1x128xf32, #tpu.memory_space<vmem>>, %arg1: memref<224x128xf32, #tpu.memory_space<vmem>>, %arg2: memref<9x128xf32, #tpu.memory_space<vmem>>) attributes {dimension_semantics = [], scalar_prefetch = 0 : i64, scratch_operands = 0 : i64, tpu.core_type = #tpu.core_type<tc>} {
    %0 = tpu.iota {dimensions = array<i32: 1>} : vector<1x128xi32>
    %c16_i32 = arith.constant 16 : i32
    %c0_i32 = arith.constant 0 : i32
    %1 = arith.cmpi eq, %c16_i32, %c0_i32 : i32
    %c1_i32 = arith.constant 1 : i32
    %2 = arith.select %1, %c1_i32, %c16_i32 : i32
    %3 = vector.broadcast %2 : i32 to vector<1x128xi32>
    %4 = arith.remsi %0, %3 : vector<1x128xi32>
    %c0_i32_0 = arith.constant 0 : i32
    %5 = vector.broadcast %c0_i32_0 : i32 to vector<1x128xi32>
    %6 = arith.cmpi ne, %4, %5 : vector<1x128xi32>
    %c0_i32_1 = arith.constant 0 : i32
    %7 = vector.broadcast %c0_i32_1 : i32 to vector<1x128xi32>
    %8 = arith.cmpi slt, %4, %7 : vector<1x128xi32>
    %c0_i32_2 = arith.constant 0 : i32
    %9 = arith.cmpi slt, %2, %c0_i32_2 : i32
    %10 = vector.broadcast %9 : i1 to vector<1x128xi1>
    %11 = vector.broadcast %10 : vector<1x128xi1> to vector<1x128xi1>
    %12 = arith.xori %8, %11 : vector<1x128xi1>
    %13 = arith.andi %12, %6 : vector<1x128xi1>
    %14 = vector.broadcast %2 : i32 to vector<1x128xi32>
    %15 = arith.addi %4, %14 : vector<1x128xi32>
    %16 = arith.select %13, %15, %4 : vector<1x128xi1>, vector<1x128xi32>
    %c1_i32_3 = arith.constant 1 : i32
    %17 = tpu.dynamic_rotate %0 by %c1_i32_3 dim 1 : vector<1x128xi32>, i32 -> vector<1x128xi32>
    %18 = vector.extract_strided_slice %17 {offsets = [0, 1], sizes = [1, 1], strides = [1, 1]} : vector<1x128xi32> to vector<1x1xi32>
    %c0_i32_4 = arith.constant 0 : i32
    %19 = vector.broadcast %c0_i32_4 : i32 to vector<1x1xi32>
    %20 = arith.cmpi eq, %18, %19 : vector<1x1xi32>
    %21 = arith.extui %20 : vector<1x1xi1> to vector<1x1xi32>
    %22 = arith.sitofp %21 : vector<1x1xi32> to vector<1x1xf32>
    %cst = arith.constant 1.000000e+00 : f32
    %23 = vector.broadcast %cst : f32 to vector<1x1xf32>
    %24 = arith.subf %23, %22 : vector<1x1xf32>
    %c0_i32_5 = arith.constant 0 : i32
    %25 = vector.broadcast %c0_i32_5 : i32 to vector<1x128xi32>
    %26 = arith.cmpi ne, %16, %25 : vector<1x128xi32>
    %27 = arith.extui %26 : vector<1x128xi1> to vector<1x128xi32>
    %28 = arith.sitofp %27 : vector<1x128xi32> to vector<1x128xf32>
    %c15_i32 = arith.constant 15 : i32
    %29 = vector.broadcast %c15_i32 : i32 to vector<1x128xi32>
    %30 = arith.cmpi ne, %16, %29 : vector<1x128xi32>
    %31 = arith.extui %30 : vector<1x128xi1> to vector<1x128xi32>
    %32 = arith.sitofp %31 : vector<1x128xi32> to vector<1x128xf32>
    %c32_i32 = arith.constant 32 : i32
    %33 = vector.broadcast %c32_i32 : i32 to vector<1x128xi32>
    %34 = arith.cmpi slt, %0, %33 : vector<1x128xi32>
    %35 = arith.extui %34 : vector<1x128xi1> to vector<1x128xi32>
    %36 = arith.sitofp %35 : vector<1x128xi32> to vector<1x128xf32>
    %37 = vector.broadcast %22 : vector<1x1xf32> to vector<1x128xf32>
    %38 = arith.mulf %37, %28 : vector<1x128xf32>
    %39 = vector.broadcast %24 : vector<1x1xf32> to vector<1x128xf32>
    %40 = arith.mulf %39, %32 : vector<1x128xf32>
    %41 = arith.addf %38, %40 : vector<1x128xf32>
    %42 = vector.broadcast %22 : vector<1x1xf32> to vector<1x128xf32>
    %43 = arith.mulf %42, %32 : vector<1x128xf32>
    %44 = vector.broadcast %24 : vector<1x1xf32> to vector<1x128xf32>
    %45 = arith.mulf %44, %28 : vector<1x128xf32>
    %46 = arith.addf %43, %45 : vector<1x128xf32>
    %47 = vector.shape_cast %41 : vector<1x128xf32> to vector<1x128xf32>
    %48 = vector.broadcast %47 : vector<1x128xf32> to vector<16x128xf32>
    %49 = vector.shape_cast %46 : vector<1x128xf32> to vector<1x128xf32>
    %50 = vector.broadcast %49 : vector<1x128xf32> to vector<16x128xf32>
    %51 = vector.shape_cast %36 : vector<1x128xf32> to vector<1x128xf32>
    %52 = vector.broadcast %51 : vector<1x128xf32> to vector<16x128xf32>
    %c0 = arith.constant 0 : index
    %c0_6 = arith.constant 0 : index
    %53 = vector.load %arg0[%c0, %c0_6] : memref<1x128xf32, #tpu.memory_space<vmem>>, vector<1x128xf32>
    %c1_i32_7 = arith.constant 1 : i32
    %54 = tpu.dynamic_rotate %53 by %c1_i32_7 dim 1 : vector<1x128xf32>, i32 -> vector<1x128xf32>
    %55 = arith.mulf %54, %41 : vector<1x128xf32>
    %c127_i32 = arith.constant 127 : i32
    %56 = tpu.dynamic_rotate %53 by %c127_i32 dim 1 : vector<1x128xf32>, i32 -> vector<1x128xf32>
    %57 = arith.mulf %56, %46 : vector<1x128xf32>
    %c0_8 = arith.constant 0 : index
    %c0_9 = arith.constant 0 : index
    %58 = vector.load %arg1[%c0_8, %c0_9] : memref<224x128xf32, #tpu.memory_space<vmem>>, vector<16x3xf32>
    %59 = vector.extract_strided_slice %58 {offsets = [0, 0], sizes = [16, 1], strides = [1, 1]} : vector<16x3xf32> to vector<16x1xf32>
    %60 = vector.broadcast %22 : vector<1x1xf32> to vector<16x1xf32>
    %61 = arith.mulf %60, %59 : vector<16x1xf32>
    %62 = vector.extract_strided_slice %58 {offsets = [0, 2], sizes = [16, 1], strides = [1, 1]} : vector<16x3xf32> to vector<16x1xf32>
    %63 = vector.broadcast %24 : vector<1x1xf32> to vector<16x1xf32>
    %64 = arith.mulf %63, %62 : vector<16x1xf32>
    %65 = arith.addf %61, %64 : vector<16x1xf32>
    %66 = vector.extract_strided_slice %58 {offsets = [0, 2], sizes = [16, 1], strides = [1, 1]} : vector<16x3xf32> to vector<16x1xf32>
    %67 = vector.broadcast %22 : vector<1x1xf32> to vector<16x1xf32>
    %68 = arith.mulf %67, %66 : vector<16x1xf32>
    %69 = vector.extract_strided_slice %58 {offsets = [0, 0], sizes = [16, 1], strides = [1, 1]} : vector<16x3xf32> to vector<16x1xf32>
    %70 = vector.broadcast %24 : vector<1x1xf32> to vector<16x1xf32>
    %71 = arith.mulf %70, %69 : vector<16x1xf32>
    %72 = arith.addf %68, %71 : vector<16x1xf32>
    %73 = vector.extract_strided_slice %58 {offsets = [0, 1], sizes = [16, 1], strides = [1, 1]} : vector<16x3xf32> to vector<16x1xf32>
    %74 = vector.broadcast %73 : vector<16x1xf32> to vector<16x128xf32>
    %75 = vector.broadcast %53 : vector<1x128xf32> to vector<16x128xf32>
    %76 = arith.mulf %74, %75 : vector<16x128xf32>
    %77 = vector.broadcast %65 : vector<16x1xf32> to vector<16x128xf32>
    %78 = vector.broadcast %55 : vector<1x128xf32> to vector<16x128xf32>
    %79 = arith.mulf %77, %78 : vector<16x128xf32>
    %80 = arith.addf %76, %79 : vector<16x128xf32>
    %81 = vector.broadcast %72 : vector<16x1xf32> to vector<16x128xf32>
    %82 = vector.broadcast %57 : vector<1x128xf32> to vector<16x128xf32>
    %83 = arith.mulf %81, %82 : vector<16x128xf32>
    %84 = arith.addf %80, %83 : vector<16x128xf32>
    %c0_10 = arith.constant 0 : index
    %c8 = arith.constant 8 : index
    %85 = vector.load %arg1[%c0_10, %c8] : memref<224x128xf32, #tpu.memory_space<vmem>>, vector<16x1xf32>
    %c0_11 = arith.constant 0 : index
    %c9 = arith.constant 9 : index
    %86 = vector.load %arg1[%c0_11, %c9] : memref<224x128xf32, #tpu.memory_space<vmem>>, vector<16x1xf32>
    %87 = arith.mulf %84, %52 : vector<16x128xf32>
    %cst_12 = arith.constant dense<0.000000e+00> : vector<16xf32>
    %88 = vector.multi_reduction <add>, %87, %cst_12 [1] : vector<16x128xf32> to vector<16xf32>
    %89 = vector.shape_cast %88 : vector<16xf32> to vector<16x1xf32>
    %90 = arith.mulf %87, %84 : vector<16x128xf32>
    %cst_13 = arith.constant dense<0.000000e+00> : vector<16xf32>
    %91 = vector.multi_reduction <add>, %90, %cst_13 [1] : vector<16x128xf32> to vector<16xf32>
    %92 = vector.shape_cast %91 : vector<16xf32> to vector<16x1xf32>
    %cst_14 = arith.constant 3.125000e-02 : f32
    %93 = vector.broadcast %cst_14 : f32 to vector<16x1xf32>
    %94 = arith.mulf %89, %93 : vector<16x1xf32>
    %cst_15 = arith.constant 3.125000e-02 : f32
    %95 = vector.broadcast %cst_15 : f32 to vector<16x1xf32>
    %96 = arith.mulf %92, %95 : vector<16x1xf32>
    %97 = arith.mulf %94, %94 : vector<16x1xf32>
    %98 = arith.subf %96, %97 : vector<16x1xf32>
    %cst_16 = arith.constant 0.000000e+00 : f32
    %99 = vector.broadcast %cst_16 : f32 to vector<16x1xf32>
    %100 = arith.maximumf %98, %99 : vector<16x1xf32>
    %cst_17 = arith.constant 9.99999974E-6 : f32
    %101 = vector.broadcast %cst_17 : f32 to vector<16x1xf32>
    %102 = arith.addf %100, %101 : vector<16x1xf32>
    %103 = math.rsqrt %102 : vector<16x1xf32>
    %104 = arith.mulf %85, %103 : vector<16x1xf32>
    %105 = arith.mulf %94, %104 : vector<16x1xf32>
    %106 = arith.subf %86, %105 : vector<16x1xf32>
    %107 = vector.broadcast %104 : vector<16x1xf32> to vector<16x128xf32>
    %108 = arith.mulf %84, %107 : vector<16x128xf32>
    %109 = vector.broadcast %106 : vector<16x1xf32> to vector<16x128xf32>
    %110 = arith.addf %108, %109 : vector<16x128xf32>
    %cst_18 = arith.constant 0.000000e+00 : f32
    %111 = vector.broadcast %cst_18 : f32 to vector<16x128xf32>
    %112 = arith.maximumf %110, %111 : vector<16x128xf32>
    %c16 = arith.constant 16 : index
    %c0_19 = arith.constant 0 : index
    %113 = vector.load %arg1[%c16, %c0_19] : memref<224x128xf32, #tpu.memory_space<vmem>>, vector<16x48xf32>
    %114 = vector.extract_strided_slice %113 {offsets = [0, 0], sizes = [16, 16], strides = [1, 1]} : vector<16x48xf32> to vector<16x16xf32>
    %115 = vector.extract_strided_slice %113 {offsets = [0, 16], sizes = [16, 16], strides = [1, 1]} : vector<16x48xf32> to vector<16x16xf32>
    %116 = vector.extract_strided_slice %113 {offsets = [0, 32], sizes = [16, 16], strides = [1, 1]} : vector<16x48xf32> to vector<16x16xf32>
    %117 = vector.broadcast %22 : vector<1x1xf32> to vector<16x16xf32>
    %118 = arith.mulf %117, %114 : vector<16x16xf32>
    %119 = vector.broadcast %24 : vector<1x1xf32> to vector<16x16xf32>
    %120 = arith.mulf %119, %116 : vector<16x16xf32>
    %121 = arith.addf %118, %120 : vector<16x16xf32>
    %122 = vector.broadcast %22 : vector<1x1xf32> to vector<16x16xf32>
    %123 = arith.mulf %122, %116 : vector<16x16xf32>
    %124 = vector.broadcast %24 : vector<1x1xf32> to vector<16x16xf32>
    %125 = arith.mulf %124, %114 : vector<16x16xf32>
    %126 = arith.addf %123, %125 : vector<16x16xf32>
    %c1_i32_20 = arith.constant 1 : i32
    %127 = tpu.dynamic_rotate %112 by %c1_i32_20 dim 1 : vector<16x128xf32>, i32 -> vector<16x128xf32>
    %128 = arith.mulf %127, %48 : vector<16x128xf32>
    %c127_i32_21 = arith.constant 127 : i32
    %129 = tpu.dynamic_rotate %112 by %c127_i32_21 dim 1 : vector<16x128xf32>, i32 -> vector<16x128xf32>
    %130 = arith.mulf %129, %50 : vector<16x128xf32>
    %cst_22 = arith.constant dense<0.000000e+00> : vector<16x128xf32>
    %131 = tpu.matmul %115, %112, %cst_22 {dimension_numbers = #tpu.dot_dimension_numbers<[1], [0], [0], [1], [0, 0, 1, 1], [], []>} : vector<16x16xf32>, vector<16x128xf32>, vector<16x128xf32> -> vector<16x128xf32>
    %cst_23 = arith.constant dense<0.000000e+00> : vector<16x128xf32>
    %132 = tpu.matmul %121, %128, %cst_23 {dimension_numbers = #tpu.dot_dimension_numbers<[1], [0], [0], [1], [0, 0, 1, 1], [], []>} : vector<16x16xf32>, vector<16x128xf32>, vector<16x128xf32> -> vector<16x128xf32>
    %133 = arith.addf %131, %132 : vector<16x128xf32>
    %cst_24 = arith.constant dense<0.000000e+00> : vector<16x128xf32>
    %134 = tpu.matmul %126, %130, %cst_24 {dimension_numbers = #tpu.dot_dimension_numbers<[1], [0], [0], [1], [0, 0, 1, 1], [], []>} : vector<16x16xf32>, vector<16x128xf32>, vector<16x128xf32> -> vector<16x128xf32>
    %135 = arith.addf %133, %134 : vector<16x128xf32>
    %c0_25 = arith.constant 0 : index
    %c10 = arith.constant 10 : index
    %136 = vector.load %arg1[%c0_25, %c10] : memref<224x128xf32, #tpu.memory_space<vmem>>, vector<16x1xf32>
    %c0_26 = arith.constant 0 : index
    %c11 = arith.constant 11 : index
    %137 = vector.load %arg1[%c0_26, %c11] : memref<224x128xf32, #tpu.memory_space<vmem>>, vector<16x1xf32>
    %138 = arith.mulf %135, %52 : vector<16x128xf32>
    %cst_27 = arith.constant dense<0.000000e+00> : vector<16xf32>
    %139 = vector.multi_reduction <add>, %138, %cst_27 [1] : vector<16x128xf32> to vector<16xf32>
    %140 = vector.shape_cast %139 : vector<16xf32> to vector<16x1xf32>
    %141 = arith.mulf %138, %135 : vector<16x128xf32>
    %cst_28 = arith.constant dense<0.000000e+00> : vector<16xf32>
    %142 = vector.multi_reduction <add>, %141, %cst_28 [1] : vector<16x128xf32> to vector<16xf32>
    %143 = vector.shape_cast %142 : vector<16xf32> to vector<16x1xf32>
    %cst_29 = arith.constant 3.125000e-02 : f32
    %144 = vector.broadcast %cst_29 : f32 to vector<16x1xf32>
    %145 = arith.mulf %140, %144 : vector<16x1xf32>
    %cst_30 = arith.constant 3.125000e-02 : f32
    %146 = vector.broadcast %cst_30 : f32 to vector<16x1xf32>
    %147 = arith.mulf %143, %146 : vector<16x1xf32>
    %148 = arith.mulf %145, %145 : vector<16x1xf32>
    %149 = arith.subf %147, %148 : vector<16x1xf32>
    %cst_31 = arith.constant 0.000000e+00 : f32
    %150 = vector.broadcast %cst_31 : f32 to vector<16x1xf32>
    %151 = arith.maximumf %149, %150 : vector<16x1xf32>
    %cst_32 = arith.constant 9.99999974E-6 : f32
    %152 = vector.broadcast %cst_32 : f32 to vector<16x1xf32>
    %153 = arith.addf %151, %152 : vector<16x1xf32>
    %154 = math.rsqrt %153 : vector<16x1xf32>
    %155 = arith.mulf %136, %154 : vector<16x1xf32>
    %156 = arith.mulf %145, %155 : vector<16x1xf32>
    %157 = arith.subf %137, %156 : vector<16x1xf32>
    %158 = vector.broadcast %155 : vector<16x1xf32> to vector<16x128xf32>
    %159 = arith.mulf %135, %158 : vector<16x128xf32>
    %160 = vector.broadcast %157 : vector<16x1xf32> to vector<16x128xf32>
    %161 = arith.addf %159, %160 : vector<16x128xf32>
    %cst_33 = arith.constant 0.000000e+00 : f32
    %162 = vector.broadcast %cst_33 : f32 to vector<16x128xf32>
    %163 = arith.maximumf %161, %162 : vector<16x128xf32>
    %c32 = arith.constant 32 : index
    %c0_34 = arith.constant 0 : index
    %164 = vector.load %arg1[%c32, %c0_34] : memref<224x128xf32, #tpu.memory_space<vmem>>, vector<16x48xf32>
    %165 = vector.extract_strided_slice %164 {offsets = [0, 0], sizes = [16, 16], strides = [1, 1]} : vector<16x48xf32> to vector<16x16xf32>
    %166 = vector.extract_strided_slice %164 {offsets = [0, 16], sizes = [16, 16], strides = [1, 1]} : vector<16x48xf32> to vector<16x16xf32>
    %167 = vector.extract_strided_slice %164 {offsets = [0, 32], sizes = [16, 16], strides = [1, 1]} : vector<16x48xf32> to vector<16x16xf32>
    %168 = vector.broadcast %22 : vector<1x1xf32> to vector<16x16xf32>
    %169 = arith.mulf %168, %165 : vector<16x16xf32>
    %170 = vector.broadcast %24 : vector<1x1xf32> to vector<16x16xf32>
    %171 = arith.mulf %170, %167 : vector<16x16xf32>
    %172 = arith.addf %169, %171 : vector<16x16xf32>
    %173 = vector.broadcast %22 : vector<1x1xf32> to vector<16x16xf32>
    %174 = arith.mulf %173, %167 : vector<16x16xf32>
    %175 = vector.broadcast %24 : vector<1x1xf32> to vector<16x16xf32>
    %176 = arith.mulf %175, %165 : vector<16x16xf32>
    %177 = arith.addf %174, %176 : vector<16x16xf32>
    %c1_i32_35 = arith.constant 1 : i32
    %178 = tpu.dynamic_rotate %163 by %c1_i32_35 dim 1 : vector<16x128xf32>, i32 -> vector<16x128xf32>
    %179 = arith.mulf %178, %48 : vector<16x128xf32>
    %c127_i32_36 = arith.constant 127 : i32
    %180 = tpu.dynamic_rotate %163 by %c127_i32_36 dim 1 : vector<16x128xf32>, i32 -> vector<16x128xf32>
    %181 = arith.mulf %180, %50 : vector<16x128xf32>
    %cst_37 = arith.constant dense<0.000000e+00> : vector<16x128xf32>
    %182 = tpu.matmul %166, %163, %cst_37 {dimension_numbers = #tpu.dot_dimension_numbers<[1], [0], [0], [1], [0, 0, 1, 1], [], []>} : vector<16x16xf32>, vector<16x128xf32>, vector<16x128xf32> -> vector<16x128xf32>
    %cst_38 = arith.constant dense<0.000000e+00> : vector<16x128xf32>
    %183 = tpu.matmul %172, %179, %cst_38 {dimension_numbers = #tpu.dot_dimension_numbers<[1], [0], [0], [1], [0, 0, 1, 1], [], []>} : vector<16x16xf32>, vector<16x128xf32>, vector<16x128xf32> -> vector<16x128xf32>
    %184 = arith.addf %182, %183 : vector<16x128xf32>
    %cst_39 = arith.constant dense<0.000000e+00> : vector<16x128xf32>
    %185 = tpu.matmul %177, %181, %cst_39 {dimension_numbers = #tpu.dot_dimension_numbers<[1], [0], [0], [1], [0, 0, 1, 1], [], []>} : vector<16x16xf32>, vector<16x128xf32>, vector<16x128xf32> -> vector<16x128xf32>
    %186 = arith.addf %184, %185 : vector<16x128xf32>
    %c0_40 = arith.constant 0 : index
    %c12 = arith.constant 12 : index
    %187 = vector.load %arg1[%c0_40, %c12] : memref<224x128xf32, #tpu.memory_space<vmem>>, vector<16x1xf32>
    %c0_41 = arith.constant 0 : index
    %c13 = arith.constant 13 : index
    %188 = vector.load %arg1[%c0_41, %c13] : memref<224x128xf32, #tpu.memory_space<vmem>>, vector<16x1xf32>
    %189 = arith.mulf %186, %52 : vector<16x128xf32>
    %cst_42 = arith.constant dense<0.000000e+00> : vector<16xf32>
    %190 = vector.multi_reduction <add>, %189, %cst_42 [1] : vector<16x128xf32> to vector<16xf32>
    %191 = vector.shape_cast %190 : vector<16xf32> to vector<16x1xf32>
    %192 = arith.mulf %189, %186 : vector<16x128xf32>
    %cst_43 = arith.constant dense<0.000000e+00> : vector<16xf32>
    %193 = vector.multi_reduction <add>, %192, %cst_43 [1] : vector<16x128xf32> to vector<16xf32>
    %194 = vector.shape_cast %193 : vector<16xf32> to vector<16x1xf32>
    %cst_44 = arith.constant 3.125000e-02 : f32
    %195 = vector.broadcast %cst_44 : f32 to vector<16x1xf32>
    %196 = arith.mulf %191, %195 : vector<16x1xf32>
    %cst_45 = arith.constant 3.125000e-02 : f32
    %197 = vector.broadcast %cst_45 : f32 to vector<16x1xf32>
    %198 = arith.mulf %194, %197 : vector<16x1xf32>
    %199 = arith.mulf %196, %196 : vector<16x1xf32>
    %200 = arith.subf %198, %199 : vector<16x1xf32>
    %cst_46 = arith.constant 0.000000e+00 : f32
    %201 = vector.broadcast %cst_46 : f32 to vector<16x1xf32>
    %202 = arith.maximumf %200, %201 : vector<16x1xf32>
    %cst_47 = arith.constant 9.99999974E-6 : f32
    %203 = vector.broadcast %cst_47 : f32 to vector<16x1xf32>
    %204 = arith.addf %202, %203 : vector<16x1xf32>
    %205 = math.rsqrt %204 : vector<16x1xf32>
    %206 = arith.mulf %187, %205 : vector<16x1xf32>
    %207 = arith.mulf %196, %206 : vector<16x1xf32>
    %208 = arith.subf %188, %207 : vector<16x1xf32>
    %209 = vector.broadcast %206 : vector<16x1xf32> to vector<16x128xf32>
    %210 = arith.mulf %186, %209 : vector<16x128xf32>
    %211 = vector.broadcast %208 : vector<16x1xf32> to vector<16x128xf32>
    %212 = arith.addf %210, %211 : vector<16x128xf32>
    %cst_48 = arith.constant 0.000000e+00 : f32
    %213 = vector.broadcast %cst_48 : f32 to vector<16x128xf32>
    %214 = arith.maximumf %212, %213 : vector<16x128xf32>
    %c48 = arith.constant 48 : index
    %c0_49 = arith.constant 0 : index
    %215 = vector.load %arg1[%c48, %c0_49] : memref<224x128xf32, #tpu.memory_space<vmem>>, vector<16x48xf32>
    %216 = vector.extract_strided_slice %215 {offsets = [0, 0], sizes = [16, 16], strides = [1, 1]} : vector<16x48xf32> to vector<16x16xf32>
    %217 = vector.extract_strided_slice %215 {offsets = [0, 16], sizes = [16, 16], strides = [1, 1]} : vector<16x48xf32> to vector<16x16xf32>
    %218 = vector.extract_strided_slice %215 {offsets = [0, 32], sizes = [16, 16], strides = [1, 1]} : vector<16x48xf32> to vector<16x16xf32>
    %219 = vector.broadcast %22 : vector<1x1xf32> to vector<16x16xf32>
    %220 = arith.mulf %219, %216 : vector<16x16xf32>
    %221 = vector.broadcast %24 : vector<1x1xf32> to vector<16x16xf32>
    %222 = arith.mulf %221, %218 : vector<16x16xf32>
    %223 = arith.addf %220, %222 : vector<16x16xf32>
    %224 = vector.broadcast %22 : vector<1x1xf32> to vector<16x16xf32>
    %225 = arith.mulf %224, %218 : vector<16x16xf32>
    %226 = vector.broadcast %24 : vector<1x1xf32> to vector<16x16xf32>
    %227 = arith.mulf %226, %216 : vector<16x16xf32>
    %228 = arith.addf %225, %227 : vector<16x16xf32>
    %c1_i32_50 = arith.constant 1 : i32
    %229 = tpu.dynamic_rotate %214 by %c1_i32_50 dim 1 : vector<16x128xf32>, i32 -> vector<16x128xf32>
    %230 = arith.mulf %229, %48 : vector<16x128xf32>
    %c127_i32_51 = arith.constant 127 : i32
    %231 = tpu.dynamic_rotate %214 by %c127_i32_51 dim 1 : vector<16x128xf32>, i32 -> vector<16x128xf32>
    %232 = arith.mulf %231, %50 : vector<16x128xf32>
    %cst_52 = arith.constant dense<0.000000e+00> : vector<16x128xf32>
    %233 = tpu.matmul %217, %214, %cst_52 {dimension_numbers = #tpu.dot_dimension_numbers<[1], [0], [0], [1], [0, 0, 1, 1], [], []>} : vector<16x16xf32>, vector<16x128xf32>, vector<16x128xf32> -> vector<16x128xf32>
    %cst_53 = arith.constant dense<0.000000e+00> : vector<16x128xf32>
    %234 = tpu.matmul %223, %230, %cst_53 {dimension_numbers = #tpu.dot_dimension_numbers<[1], [0], [0], [1], [0, 0, 1, 1], [], []>} : vector<16x16xf32>, vector<16x128xf32>, vector<16x128xf32> -> vector<16x128xf32>
    %235 = arith.addf %233, %234 : vector<16x128xf32>
    %cst_54 = arith.constant dense<0.000000e+00> : vector<16x128xf32>
    %236 = tpu.matmul %228, %232, %cst_54 {dimension_numbers = #tpu.dot_dimension_numbers<[1], [0], [0], [1], [0, 0, 1, 1], [], []>} : vector<16x16xf32>, vector<16x128xf32>, vector<16x128xf32> -> vector<16x128xf32>
    %237 = arith.addf %235, %236 : vector<16x128xf32>
    %c0_55 = arith.constant 0 : index
    %c14 = arith.constant 14 : index
    %238 = vector.load %arg1[%c0_55, %c14] : memref<224x128xf32, #tpu.memory_space<vmem>>, vector<16x1xf32>
    %c0_56 = arith.constant 0 : index
    %c15 = arith.constant 15 : index
    %239 = vector.load %arg1[%c0_56, %c15] : memref<224x128xf32, #tpu.memory_space<vmem>>, vector<16x1xf32>
    %240 = arith.mulf %237, %52 : vector<16x128xf32>
    %cst_57 = arith.constant dense<0.000000e+00> : vector<16xf32>
    %241 = vector.multi_reduction <add>, %240, %cst_57 [1] : vector<16x128xf32> to vector<16xf32>
    %242 = vector.shape_cast %241 : vector<16xf32> to vector<16x1xf32>
    %243 = arith.mulf %240, %237 : vector<16x128xf32>
    %cst_58 = arith.constant dense<0.000000e+00> : vector<16xf32>
    %244 = vector.multi_reduction <add>, %243, %cst_58 [1] : vector<16x128xf32> to vector<16xf32>
    %245 = vector.shape_cast %244 : vector<16xf32> to vector<16x1xf32>
    %cst_59 = arith.constant 3.125000e-02 : f32
    %246 = vector.broadcast %cst_59 : f32 to vector<16x1xf32>
    %247 = arith.mulf %242, %246 : vector<16x1xf32>
    %cst_60 = arith.constant 3.125000e-02 : f32
    %248 = vector.broadcast %cst_60 : f32 to vector<16x1xf32>
    %249 = arith.mulf %245, %248 : vector<16x1xf32>
    %250 = arith.mulf %247, %247 : vector<16x1xf32>
    %251 = arith.subf %249, %250 : vector<16x1xf32>
    %cst_61 = arith.constant 0.000000e+00 : f32
    %252 = vector.broadcast %cst_61 : f32 to vector<16x1xf32>
    %253 = arith.maximumf %251, %252 : vector<16x1xf32>
    %cst_62 = arith.constant 9.99999974E-6 : f32
    %254 = vector.broadcast %cst_62 : f32 to vector<16x1xf32>
    %255 = arith.addf %253, %254 : vector<16x1xf32>
    %256 = math.rsqrt %255 : vector<16x1xf32>
    %257 = arith.mulf %238, %256 : vector<16x1xf32>
    %258 = arith.mulf %247, %257 : vector<16x1xf32>
    %259 = arith.subf %239, %258 : vector<16x1xf32>
    %260 = vector.broadcast %257 : vector<16x1xf32> to vector<16x128xf32>
    %261 = arith.mulf %237, %260 : vector<16x128xf32>
    %262 = vector.broadcast %259 : vector<16x1xf32> to vector<16x128xf32>
    %263 = arith.addf %261, %262 : vector<16x128xf32>
    %cst_63 = arith.constant 0.000000e+00 : f32
    %264 = vector.broadcast %cst_63 : f32 to vector<16x128xf32>
    %265 = arith.maximumf %263, %264 : vector<16x128xf32>
    %c64 = arith.constant 64 : index
    %c0_64 = arith.constant 0 : index
    %266 = vector.load %arg1[%c64, %c0_64] : memref<224x128xf32, #tpu.memory_space<vmem>>, vector<16x48xf32>
    %267 = vector.extract_strided_slice %266 {offsets = [0, 0], sizes = [16, 16], strides = [1, 1]} : vector<16x48xf32> to vector<16x16xf32>
    %268 = vector.extract_strided_slice %266 {offsets = [0, 16], sizes = [16, 16], strides = [1, 1]} : vector<16x48xf32> to vector<16x16xf32>
    %269 = vector.extract_strided_slice %266 {offsets = [0, 32], sizes = [16, 16], strides = [1, 1]} : vector<16x48xf32> to vector<16x16xf32>
    %270 = vector.broadcast %22 : vector<1x1xf32> to vector<16x16xf32>
    %271 = arith.mulf %270, %267 : vector<16x16xf32>
    %272 = vector.broadcast %24 : vector<1x1xf32> to vector<16x16xf32>
    %273 = arith.mulf %272, %269 : vector<16x16xf32>
    %274 = arith.addf %271, %273 : vector<16x16xf32>
    %275 = vector.broadcast %22 : vector<1x1xf32> to vector<16x16xf32>
    %276 = arith.mulf %275, %269 : vector<16x16xf32>
    %277 = vector.broadcast %24 : vector<1x1xf32> to vector<16x16xf32>
    %278 = arith.mulf %277, %267 : vector<16x16xf32>
    %279 = arith.addf %276, %278 : vector<16x16xf32>
    %c1_i32_65 = arith.constant 1 : i32
    %280 = tpu.dynamic_rotate %265 by %c1_i32_65 dim 1 : vector<16x128xf32>, i32 -> vector<16x128xf32>
    %281 = arith.mulf %280, %48 : vector<16x128xf32>
    %c127_i32_66 = arith.constant 127 : i32
    %282 = tpu.dynamic_rotate %265 by %c127_i32_66 dim 1 : vector<16x128xf32>, i32 -> vector<16x128xf32>
    %283 = arith.mulf %282, %50 : vector<16x128xf32>
    %cst_67 = arith.constant dense<0.000000e+00> : vector<16x128xf32>
    %284 = tpu.matmul %268, %265, %cst_67 {dimension_numbers = #tpu.dot_dimension_numbers<[1], [0], [0], [1], [0, 0, 1, 1], [], []>} : vector<16x16xf32>, vector<16x128xf32>, vector<16x128xf32> -> vector<16x128xf32>
    %cst_68 = arith.constant dense<0.000000e+00> : vector<16x128xf32>
    %285 = tpu.matmul %274, %281, %cst_68 {dimension_numbers = #tpu.dot_dimension_numbers<[1], [0], [0], [1], [0, 0, 1, 1], [], []>} : vector<16x16xf32>, vector<16x128xf32>, vector<16x128xf32> -> vector<16x128xf32>
    %286 = arith.addf %284, %285 : vector<16x128xf32>
    %cst_69 = arith.constant dense<0.000000e+00> : vector<16x128xf32>
    %287 = tpu.matmul %279, %283, %cst_69 {dimension_numbers = #tpu.dot_dimension_numbers<[1], [0], [0], [1], [0, 0, 1, 1], [], []>} : vector<16x16xf32>, vector<16x128xf32>, vector<16x128xf32> -> vector<16x128xf32>
    %288 = arith.addf %286, %287 : vector<16x128xf32>
    %c0_70 = arith.constant 0 : index
    %c16_71 = arith.constant 16 : index
    %289 = vector.load %arg1[%c0_70, %c16_71] : memref<224x128xf32, #tpu.memory_space<vmem>>, vector<16x1xf32>
    %c0_72 = arith.constant 0 : index
    %c17 = arith.constant 17 : index
    %290 = vector.load %arg1[%c0_72, %c17] : memref<224x128xf32, #tpu.memory_space<vmem>>, vector<16x1xf32>
    %291 = arith.mulf %288, %52 : vector<16x128xf32>
    %cst_73 = arith.constant dense<0.000000e+00> : vector<16xf32>
    %292 = vector.multi_reduction <add>, %291, %cst_73 [1] : vector<16x128xf32> to vector<16xf32>
    %293 = vector.shape_cast %292 : vector<16xf32> to vector<16x1xf32>
    %294 = arith.mulf %291, %288 : vector<16x128xf32>
    %cst_74 = arith.constant dense<0.000000e+00> : vector<16xf32>
    %295 = vector.multi_reduction <add>, %294, %cst_74 [1] : vector<16x128xf32> to vector<16xf32>
    %296 = vector.shape_cast %295 : vector<16xf32> to vector<16x1xf32>
    %cst_75 = arith.constant 3.125000e-02 : f32
    %297 = vector.broadcast %cst_75 : f32 to vector<16x1xf32>
    %298 = arith.mulf %293, %297 : vector<16x1xf32>
    %cst_76 = arith.constant 3.125000e-02 : f32
    %299 = vector.broadcast %cst_76 : f32 to vector<16x1xf32>
    %300 = arith.mulf %296, %299 : vector<16x1xf32>
    %301 = arith.mulf %298, %298 : vector<16x1xf32>
    %302 = arith.subf %300, %301 : vector<16x1xf32>
    %cst_77 = arith.constant 0.000000e+00 : f32
    %303 = vector.broadcast %cst_77 : f32 to vector<16x1xf32>
    %304 = arith.maximumf %302, %303 : vector<16x1xf32>
    %cst_78 = arith.constant 9.99999974E-6 : f32
    %305 = vector.broadcast %cst_78 : f32 to vector<16x1xf32>
    %306 = arith.addf %304, %305 : vector<16x1xf32>
    %307 = math.rsqrt %306 : vector<16x1xf32>
    %308 = arith.mulf %289, %307 : vector<16x1xf32>
    %309 = arith.mulf %298, %308 : vector<16x1xf32>
    %310 = arith.subf %290, %309 : vector<16x1xf32>
    %311 = vector.broadcast %308 : vector<16x1xf32> to vector<16x128xf32>
    %312 = arith.mulf %288, %311 : vector<16x128xf32>
    %313 = vector.broadcast %310 : vector<16x1xf32> to vector<16x128xf32>
    %314 = arith.addf %312, %313 : vector<16x128xf32>
    %cst_79 = arith.constant 0.000000e+00 : f32
    %315 = vector.broadcast %cst_79 : f32 to vector<16x128xf32>
    %316 = arith.maximumf %314, %315 : vector<16x128xf32>
    %c96 = arith.constant 96 : index
    %c0_80 = arith.constant 0 : index
    %317 = vector.load %arg1[%c96, %c0_80] : memref<224x128xf32, #tpu.memory_space<vmem>>, vector<128x128xf32>
    %cst_81 = arith.constant dense<0.000000e+00> : vector<16x128xf32>
    %318 = tpu.matmul %316, %317, %cst_81 {dimension_numbers = #tpu.dot_dimension_numbers<[1], [0], [0], [1], [0, 0, 1, 1], [], []>} : vector<16x128xf32>, vector<128x128xf32>, vector<16x128xf32> -> vector<16x128xf32>
    %c80 = arith.constant 80 : index
    %c0_82 = arith.constant 0 : index
    %319 = vector.load %arg1[%c80, %c0_82] : memref<224x128xf32, #tpu.memory_space<vmem>>, vector<9x16xf32>
    %c80_83 = arith.constant 80 : index
    %c16_84 = arith.constant 16 : index
    %320 = vector.load %arg1[%c80_83, %c16_84] : memref<224x128xf32, #tpu.memory_space<vmem>>, vector<9x1xf32>
    %cst_85 = arith.constant dense<0.000000e+00> : vector<9x128xf32>
    %321 = tpu.matmul %319, %318, %cst_85 {dimension_numbers = #tpu.dot_dimension_numbers<[1], [0], [0], [1], [0, 0, 1, 1], [], []>} : vector<9x16xf32>, vector<16x128xf32>, vector<9x128xf32> -> vector<9x128xf32>
    %322 = vector.broadcast %320 : vector<9x1xf32> to vector<9x128xf32>
    %323 = arith.addf %321, %322 : vector<9x128xf32>
    %c0_86 = arith.constant 0 : index
    %c0_87 = arith.constant 0 : index
    %324 = vector.load %arg2[%c0_86, %c0_87] : memref<9x128xf32, #tpu.memory_space<vmem>>, vector<9x128xf32>
    tpu.vector_store %arg2[%c0_86, %c0_87], %323 {strides = array<i32>} : memref<9x128xf32, #tpu.memory_space<vmem>>, vector<9x128xf32>,
    return
  }
}

</mosaic_0001>

<bundles_post_ra>
// kernel: tpu_custom_call.1
= control target key start
LH: loop header
LB: loop body
LE: loop exit
PB: predicated region body
PF: predicated region fallthrough
CT: control target
= control target key end

     0   :  { %7 = vsyncpa [#allocation3], 0  ;;  %s2670_s0 = inlined_call_operand.hbm [shape: f32[1,128], index: 0, kind: input, shape index: {}]   ;;  %s2671_s1 = inlined_call_operand.hbm [shape: f32[224,128], index: 1, kind: input, shape index: {}]   ;;  %s2672_s2 = inlined_call_operand.hbm [shape: f32[9,128], index: 2, kind: output, shape index: {}]  }
   0x1   :  { %8 = vsyncpa [#allocation6], 0 }
   0x2   :  { %9 = vsyncpa [#allocation4], 0  ;;  %s2350_s9 = smov [#allocation2]   ;;  %s2351_s11 = smov [#allocation5]  }
   0x3   :  { %s16_s10 = sshll.u32 %s2350_s9, 4  ;;  %s25_s12 = sshll.u32 %s2351_s11, 4  ;;  %s17_s10 = int_to_ptr.vmem [resolvable:$true] %s16_s10  ;;  %s2387_s12 = int_to_ptr.vmem [resolvable:$true] %s25_s12 }
   0x4   :  { %s2278_s15 = scalar_lea.hbm %s2670_s0, 16 }
   0x5   :  { %p2279_p0 = scmp.ne.s32.totalorder %s2670_s0, %s2278_s15  ;;  %p2282_p1 = scmp.lt.u32.totalorder %s2278_s15, %s2670_s0 }
   0x7   :  { %p2284_p2 = pnand %p2282_p1, %p2279_p0 }
   0x9   :  { %2287 = shalt.err (!%p2284_p2)
}
   0xa   :  { %s2288_s20 = scalar_lea.vmem %s17_s10, 16  ;;  %s2292_s21 = scalar_lea.vmem %s17_s10, 32 }
   0xb   :  { %p2289_p3 = scmp.ne.s32.totalorder %s17_s10, %s2288_s20  ;;  %p2293_p4 = scmp.lt.s32.totalorder %s17_s10, %s17_s10 }
   0xc   :  { %p2294_p5 = scmp.lt.s32.totalorder %s2292_s21, %s2288_s20 }
   0xe   :  { %p2295_p6 = por %p2294_p5, %p2293_p4 }
  0x10   :  { %p2296_p7 = pnand %p2295_p6, %p2289_p3 }
  0x12   :  { %2299 = shalt.err (!%p2296_p7)
}
  0x13   :  { %19 = dma.hbm_to_vmem [thread:$0]  %s2670_s0, 16, %s17_s10, [#allocation3]  }
  0x14   :  { %s2300_s26 = scalar_lea.hbm %s2671_s1, 3584 }
  0x15   :  { %p2301_p8 = scmp.ne.s32.totalorder %s2671_s1, %s2300_s26  ;;  %p2304_p9 = scmp.lt.u32.totalorder %s2300_s26, %s2671_s1 }
  0x17   :  { %p2306_p10 = pnand %p2304_p9, %p2301_p8 }
  0x19   :  { %2309 = shalt.err (!%p2306_p10)
}
  0x1a   :  { %s2310_s3 = scalar_lea.vmem %s2387_s12, 3584  ;;  %p2315_p12 = scmp.lt.s32.totalorder %s2387_s12, %s2387_s12 }
  0x1b   :  { %p2311_p11 = scmp.ne.s32.totalorder %s2387_s12, %s2310_s3  ;;  %p2316_p13 = scmp.lt.s32.totalorder %s2310_s3, %s2310_s3 }
  0x1d   :  { %p2317_p0 = por %p2316_p13, %p2315_p12 }
  0x1f   :  { %p2318_p1 = pnand %p2317_p0, %p2311_p11 }
  0x21   :  { %2321 = shalt.err (!%p2318_p1)
}
  0x22   :  { %s2352_s0 = smov 128   ;;  %s2353_s4 = smov 8  }
  0x23   :  { %31 = dma.hbm_to_vmem [thread:$0]  %s2671_s1, 3584, %s2387_s12, [#allocation6], %s2352_s0, %s2352_s0, %s2353_s4  }
  0x24   :  { %2344 = dma.done.wait [#allocation3], 16  }
  0x25   :  { %2345 = vsyncadd [#allocation3], 4294967280 }
  0x26   :  { %2346 = dma.done.wait [#allocation6], 3584  }
  0x27   :  { %2347 = vsyncadd [#allocation6], 4294963712  ;;  %v38_v0 = vlaneseq  ;;  %v2354_v1 = vmov 1   ;;  %s2355_s7 = smov 1   ;;  %v2425_v3 = vld [vmem:[#allocation5 + $0x8] sm:$0xff]  ;;  %v2427_v4 = vld [vmem:[#allocation5] sm:$0xff] }
  0x28   :  { %2237 = vset.pattern.permute.xlu1 %v2354_v1  ;;  %2238 = vset.pattern.permute.xlu0 %v2354_v1  ;;  %s2356_s1 = smov 127   ;;  %v2357_v8 = vmov 0.0   ;;  %v91_v29 = vld [vmem:[#allocation2] sm:$0x1]  ;;  %s2360_s10 = smov 32   ;;  %vm298_vm4 = vcmask 130048  }
  0x29   :  { %v2421_v2 = vand.u32 127, %v38_v0  ;;  %108 = vrot.lane.b32.xlu1 %v2425_v3, %s2355_s7  ;;  %v84_v5 = vshrl.u32 %v38_v0, 7  ;;  %s2361_s11 = smov 96   ;;  %s2362_s12 = smov 112  }
  0x2a   :  { %s2371_s13 = smov [#allocation7]  }
  0x2b   :  { %52 = vrot.lane.b32.xlu0 %v2421_v2, %s2355_s7  ;;  %v2438_v7 = vsub.s32 0, %v84_v5  ;;  %v44_v32 = vand.u32 15, %v2421_v2  ;;  %vm64_vm3 = vcmp.lt.s32.totalorder %v2421_v2, 32  ;;  %s1872_s14 = sshll.u32 %s2371_s13, 4  ;;  %s1873_s14 = int_to_ptr.vmem [resolvable:$true] %s1872_s14 }
  0x2c   :  { %v2469_v62 = vsel %vm64_vm3, 1.0, %v2357_v8  ;;  %s2322_s15 = scalar_lea.vmem %s1873_s14, 256  ;;  %p2327_p3 = scmp.lt.s32.totalorder %s1873_s14, %s1873_s14 }
  0x2d   :  { %118 = vrot.lane.b32.xlu1 %v2427_v4, %s2356_s1  ;;  %vm58_vm1 = vcmp.ne.s32.totalorder %v44_v32, 0  ;;  %vm61_vm2 = vcmp.ne.s32.totalorder %v44_v32, 15  ;;  %v146_v49 = vrot.slane %v91_v29, %v2438_v7  ;;  %p2323_p2 = scmp.ne.s32.totalorder %s1873_s14, %s2322_s15  ;;  %p2328_p4 = scmp.lt.s32.totalorder %s2322_s15, %s2322_s15 }
  0x2e   :  { %v1886_v37 = vsel %vm58_vm1, 1.0, %v2357_v8  ;;  %v1887_v38 = vsel %vm61_vm2, 1.0, %v2357_v8 }
  0x2f   :  { %106 = vrot.lane.b32.xlu0 %v2427_v4, %s2355_s7  ;;  %p2329_p5 = por %p2328_p4, %p2327_p3 }
  0x31   :  { %135 = vperm.xlu1 %2237, %v2427_v4   ;;  %p2330_p6 = pnand %p2329_p5, %p2323_p2 }
  0x33   :  { %120 = vrot.lane.b32.xlu0 %v2425_v3, %s2356_s1 }
  0x9b   :  { %v109_v11 = vpop.permute.xlu1 %108 }
  0x9d   :  { %v53_v6 = vpop.permute.xlu0 %52 }
  0x9e   :  { %vm54_vm0 = vcmp.eq.s32.totalorder %v53_v6, 0 }
  0x9f   :  { %v2441_v9 = vsel %vm54_vm0, 1.0, %v2357_v8  ;;  %v119_v15 = vpop.permute.xlu1 %118  ;;  %v2358_v8 = vmov 8  }
  0xa0   :  { %v2444_v10 = vsub.f32 1.0, %v2441_v9  ;;  %69 = vperm.xlu1 %2237, %v2441_v9   ;;  %v103_v13 = vrot.slane %v2441_v9, %v2438_v7 }
  0xa1   :  { %v107_v12 = vpop.permute.xlu0 %106 }
  0xa2   :  { %75 = vperm.xlu0 %2238, %v2444_v10   ;;  %v117_v14 = vrot.slane %v2444_v10, %v2438_v7  ;;  %v113_v17 = vmul.f32 %v109_v11, %v103_v13  ;;  %v112_v18 = vmul.f32 %v107_v12, %v103_v13  ;;  %v128_v21 = vmul.f32 %v119_v15, %v103_v13 }
  0xa4   :  { %139 = vperm.xlu1 %2237, %v2425_v3   ;;  %v124_v19 = vmul.f32 %v119_v15, %v117_v14  ;;  %v131_v25 = vmul.f32 %v117_v14, %v109_v11  ;;  %v130_v26 = vmul.f32 %v117_v14, %v107_v12 }
  0xa5   :  { %v121_v16 = vpop.permute.xlu0 %120 }
  0xa6   :  { %v125_v20 = vmul.f32 %v121_v16, %v117_v14  ;;  %v129_v22 = vmul.f32 %v121_v16, %v103_v13  ;;  %v126_v23 = vadd.f32 %v124_v19, %v112_v18  ;;  %v132_v27 = vadd.f32 %v130_v26, %v128_v21 }
  0xa8   :  { %v127_v24 = vadd.f32 %v125_v20, %v113_v17  ;;  %152 = vperm.xlu0 %2238, %v126_v23   ;;  %v133_v28 = vadd.f32 %v131_v25, %v129_v22 }
  0xaa   :  { %157 = vperm.xlu1 %2237, %v127_v24  }
  0xac   :  { %170 = vperm.xlu0 %2238, %v132_v27  }
  0xae   :  { %175 = vperm.xlu1 %2237, %v133_v28  }
  0xb0   :  { %92 = vrot.lane.b32.xlu0 %v91_v29, %s2355_s7  ;;  %v136_v30 = vpop.permute.xlu1 %135 }
  0xb1   :  { %v148_v54 = vmul.f32 %v146_v49, %v136_v30  ;;  %2239 = vset.pattern.permute.xlu0 %v2358_v8 }
  0xb2   :  { %95 = vrot.lane.b32.xlu1 %v91_v29, %s2356_s1 }
  0xb3   :  { %2240 = vset.pattern.permute.xlu1 %v2358_v8 }
 0x11f   :  { %v70_v31 = vpop.permute.xlu1 %69 }
 0x120   :  { %v72_v43 = vmul.f32 %v1886_v37, %v70_v31  ;;  %v80_v44 = vmul.f32 %v1887_v38, %v70_v31 }
 0x121   :  { %v76_v33 = vpop.permute.xlu0 %75 }
 0x122   :  { %v78_v39 = vmul.f32 %v1887_v38, %v76_v33  ;;  %v81_v40 = vmul.f32 %v1886_v37, %v76_v33  ;;  %v2359_v33 = vmov 9   ;;  %v252_v38 = vld [vmem:[#allocation5 + $0x10] sm:$0xff] }
 0x123   :  { %v140_v34 = vpop.permute.xlu1 %139 }
 0x124   :  { %v2458_v45 = vadd.f32 %v81_v40, %v80_v44  ;;  %v2460_v46 = vadd.f32 %v78_v39, %v72_v43  ;;  %v149_v55 = vmul.f32 %v146_v49, %v140_v34 }
 0x127   :  { %v153_v36 = vpop.permute.xlu0 %152 }
 0x129   :  { %v158_v35 = vpop.permute.xlu1 %157 }
 0x12b   :  { %v171_v42 = vpop.permute.xlu0 %170 }
 0x12d   :  { %v176_v41 = vpop.permute.xlu1 %175 }
 0x12f   :  { %v93_v48 = vpop.permute.xlu0 %92 }
 0x130   :  { %v94_v51 = vmul.f32 %v93_v48, %v2460_v46 }
 0x131   :  { %v96_v47 = vpop.permute.xlu1 %95 }
 0x132   :  { %v97_v50 = vmul.f32 %v96_v47, %v2458_v45  ;;  %v163_v53 = vrot.slane %v94_v51, %v2438_v7 }
 0x134   :  { %v181_v52 = vrot.slane %v97_v50, %v2438_v7  ;;  %v164_v56 = vmul.f32 %v163_v53, %v153_v36  ;;  %v165_v57 = vmul.f32 %v163_v53, %v158_v35 }
 0x136   :  { %v182_v58 = vmul.f32 %v181_v52, %v171_v42  ;;  %v183_v59 = vmul.f32 %v181_v52, %v176_v41  ;;  %v166_v60 = vadd.f32 %v164_v56, %v148_v54  ;;  %v167_v61 = vadd.f32 %v165_v57, %v149_v55  ;;  %v253_v41 = vld [vmem:[#allocation5 + $0x18] sm:$0xff] }
 0x138   :  { %v2471_v63 = vadd.f32 %v183_v59, %v167_v61  ;;  %v2473_v0 = vadd.f32 %v182_v58, %v166_v60 }
 0x13a   :  { %v187_v1 = vmul.f32 %v2469_v62, %v2471_v63  ;;  %v186_v2 = vmul.f32 %v2469_v62, %v2473_v0 }
 0x13c   :  { %190 = vadd.xlane.f32.xlu1 %v187_v1  ;;  %188 = vadd.xlane.f32.xlu0 %v186_v2  ;;  %v192_v5 = vmul.f32 %v186_v2, %v2473_v0  ;;  %v193_v6 = vmul.f32 %v187_v1, %v2471_v63  ;;  %v2518_v1 = vrot.slane %v2460_v46, %v2438_v7 }
 0x140   :  { %194 = vadd.xlane.f32.xlu0 %v192_v5 }
 0x144   :  { %196 = vadd.xlane.f32.xlu0 %v193_v6 }
 0x14d   :  { %254 = vrot.lane.b32.xlu1 %v2441_v9, %s2356_s1 }
 0x15a   :  { %261 = vrot.lane.b32.xlu0 %v2444_v10, %s2356_s1 }
 0x1c9   :  { %v191_v11 = vpop.xlane.xlu1 %190  ;;  %v189_v12 = vpop.xlane.xlu0 %188 }
 0x1ca   :  { %v198_v13 = vmul.f32 0.03125, %v189_v12  ;;  %v199_v16 = vmul.f32 0.03125, %v191_v11 }
 0x1cc   :  { %v202_v17 = vmul.f32 %v198_v13, %v198_v13  ;;  %v203_v21 = vmul.f32 %v199_v16, %v199_v16 }
 0x1cd   :  { %v255_v14 = vpop.permute.xlu1 %254  ;;  %v195_v15 = vpop.xlane.xlu0 %194 }
 0x1ce   :  { %v200_v18 = vmul.f32 0.03125, %v195_v15  ;;  %2211 = vpush %v255_v14  ;;  %v2525_v15 = vrot.slane %v2458_v45, %v2438_v7 }
 0x1d0   :  { %v204_v19 = vsub.f32 %v200_v18, %v202_v17 }
 0x1d1   :  { %v197_v20 = vpop.xlane.xlu0 %196 }
 0x1d2   :  { %v206_v22 = vmax.f32 %v204_v19, 0.0  ;;  %v201_v9 = vmul.f32 0.03125, %v197_v20 }
 0x1d4   :  { %v208_v23 = vadd.f32 1e-05, %v206_v22  ;;  %v205_v24 = vsub.f32 %v201_v9, %v203_v21 }
 0x1d5   :  { %v262_v10 = vpop.permute.xlu0 %261 }
 0x1d6   :  { %2256 = vrsqrt.f32 %v208_v23  ;;  %v207_v25 = vmax.f32 %v205_v24, 0.0  ;;  %2213 = vpush %v262_v10 }
 0x1d8   :  { %v209_v26 = vadd.f32 1e-05, %v207_v25 }
 0x1da   :  { %2258 = vrsqrt.f32 %v209_v26  ;;  %v2363_v26 = vmov 10  }
 0x1e0   :  { %v2257_v27 = vpop.eup %2256 }
 0x1e1   :  { %v212_v28 = vmul.f32 %v2257_v27, %v2427_v4 }
 0x1e3   :  { %228 = vperm.xlu0 %2239, %v212_v28   ;;  %v214_v29 = vmul.f32 %v212_v28, %v198_v13 }
 0x1e4   :  { %v2259_v30 = vpop.eup %2258 }
 0x1e5   :  { %218 = vrot.lane.b32.xlu1 %v214_v29, %s2355_s7  ;;  %v213_v31 = vmul.f32 %v2259_v30, %v2425_v3 }
 0x1e7   :  { %v215_v32 = vmul.f32 %v213_v31, %v199_v16  ;;  %2242 = vset.pattern.permute.xlu0 %v2359_v33 }
 0x1e9   :  { %220 = vrot.lane.b32.xlu1 %v215_v32, %s2355_s7 }
 0x1ed   :  { %233 = vperm.xlu1 %2240, %v213_v31  }
 0x1f1   :  { %2241 = vset.pattern.permute.xlu1 %v2359_v33 }
 0x1ff   :  { %s2489_s8 = spop %2211 }
 0x200   :  { %v2507_v56 = vstv %s2489_s8 }
 0x201   :  { %v259_v58 = vmul.f32 %v2507_v56, %v252_v38  ;;  %v260_v61 = vmul.f32 %v2507_v56, %v253_v41 }
 0x207   :  { %s2214_s9 = spop %2213 }
 0x208   :  { %v2492_v36 = vstv %s2214_s9 }
 0x209   :  { %v266_v40 = vmul.f32 %v2492_v36, %v252_v38  ;;  %v267_v42 = vmul.f32 %v2492_v36, %v253_v41 }
 0x257   :  { %v219_v34 = vpop.permute.xlu1 %218 }
 0x258   :  { %v224_v35 = vsub.f32 %v2427_v4, %v219_v34 }
 0x25a   :  { %240 = vperm.xlu1 %2241, %v224_v35  }
 0x25b   :  { %v221_v37 = vpop.permute.xlu1 %220 }
 0x25c   :  { %v225_v39 = vsub.f32 %v2425_v3, %v221_v37 }
 0x25e   :  { %245 = vperm.xlu0 %2242, %v225_v39   ;;  %278 = vrot.lane.b32.xlu1 %v266_v40, %s2360_s10 }
 0x25f   :  { %2243 = vset.pattern.permute.xlu1 %v2363_v26 }
 0x262   :  { %280 = vrot.lane.b32.xlu1 %v267_v42, %s2360_s10  ;;  %v229_v43 = vpop.permute.xlu0 %228 }
 0x263   :  { %v236_v47 = vmul.f32 %v229_v43, %v2473_v0 }
 0x26c   :  { %v234_v44 = vpop.permute.xlu1 %233 }
 0x26d   :  { %v237_v50 = vmul.f32 %v234_v44, %v2471_v63  ;;  %v2364_v44 = vmov 11  }
 0x26e   :  { %2244 = vset.pattern.permute.xlu0 %v2364_v44 }
 0x2d9   :  { %v241_v48 = vpop.permute.xlu1 %240 }
 0x2da   :  { %v248_v49 = vadd.f32 %v241_v48, %v236_v47 }
 0x2dc   :  { %v250_v51 = vmax.f32 %v248_v49, 0.0 }
 0x2dd   :  { %v246_v52 = vpop.permute.xlu0 %245  ;;  %v279_v57 = vpop.permute.xlu1 %278 }
 0x2de   :  { %v249_v53 = vadd.f32 %v246_v52, %v237_v50  ;;  %286 = vrot.lane.b32.xlu0 %v250_v51, %s2355_s7  ;;  %v284_v59 = vadd.f32 %v279_v57, %v259_v58  ;;  %v619_v57 = vld [vmem:[#allocation5 + $0x28] sm:$0xff] }
 0x2e0   :  { %v251_v54 = vmax.f32 %v249_v53, 0.0 }
 0x2e1   :  { %v281_v60 = vpop.permute.xlu1 %280 }
 0x2e2   :  { %270 = vrot.lane.b32.xlu0 %v266_v40, %s2361_s11  ;;  %288 = vrot.lane.b32.xlu1 %v251_v54, %s2355_s7  ;;  %v2115_v55 = vpack.c.bf16 %v251_v54, %v250_v51  ;;  %v285_v63 = vadd.f32 %v281_v60, %v260_v61  ;;  %v618_v60 = vld [vmem:[#allocation5 + $0x20] sm:$0xff] }
 0x2e6   :  { %382 = vrot.lane.b32.xlu0 %v252_v38, %s2362_s12  ;;  %272 = vrot.lane.b32.xlu1 %v267_v42, %s2361_s11 }
 0x2ea   :  { %294 = vrot.lane.b32.xlu0 %v251_v54, %s2356_s1  ;;  %292 = vrot.lane.b32.xlu1 %v250_v51, %s2356_s1 }
 0x2ee   :  { %467 = vrot.lane.b32.xlu0 %v284_v59, %s2361_s11  ;;  %384 = vrot.lane.b32.xlu1 %v253_v41, %s2362_s12  ;;  %v623_v59 = vmul.f32 %v619_v57, %v2492_v36 }
 0x2f2   :  { %469 = vrot.lane.b32.xlu1 %v285_v63, %s2361_s11 }
 0x350   :  { %v287_v0 = vpop.permute.xlu0 %286 }
 0x351   :  { %v290_v6 = vmul.f32 %v287_v0, %v2518_v1 }
 0x354   :  { %v289_v2 = vpop.permute.xlu1 %288  ;;  %v271_v5 = vpop.permute.xlu0 %270 }
 0x355   :  { %v291_v8 = vmul.f32 %v289_v2, %v2518_v1  ;;  %v276_v11 = vadd.f32 %v271_v5, %v259_v58 }
 0x357   :  { %1989 = vmatprep.mubr.msk.f32.mxu1 %vm298_vm4, %v276_v11  ;;  %v2111_v12 = vpack.c.bf16 %v291_v8, %v290_v6 }
 0x358   :  { %v273_v13 = vpop.permute.xlu1 %272  ;;  %v383_v14 = vpop.permute.xlu0 %382 }
 0x359   :  { %2112 = vmatprep.subr.bf16.mxu1 %v2111_v12  ;;  %v277_v46 = vadd.f32 %v273_v13, %v260_v61  ;;  %v622_v61 = vmul.f32 %v618_v60, %v2492_v36 }
 0x35a   :  { %2114 = vmatpush3.bf16.msra.mxu1 %v2111_v12 }
 0x35b   :  { %2116 = vmatprep.subr.bf16.mxu1 %v2115_v55 }
 0x35c   :  { %v293_v16 = vpop.permute.xlu1 %292  ;;  %v295_v17 = vpop.permute.xlu0 %294 }
 0x35d   :  { %v296_v18 = vmul.f32 %v293_v16, %v2525_v15  ;;  %v297_v19 = vmul.f32 %v295_v17, %v2525_v15  ;;  %1990 = vmatmul.mubr.msk.f32.vlgmr.msra.gmra.mrb[0].mxu1 %vm298_vm4, %v277_v46  ;;  %v620_v17 = vmul.f32 %v618_v60, %v2507_v56 }
 0x35e   :  { %2118 = vmatpush3.bf16.msra.mxu1 %v2115_v55  ;;  %1996 = vmatprep.mubr.msk.f32.mxu1 %vm298_vm4, %v383_v14 }
 0x35f   :  { %v2119_v20 = vpack.c.bf16 %v297_v19, %v296_v18 }
 0x360   :  { %v385_v21 = vpop.permute.xlu1 %384  ;;  %v468_v22 = vpop.permute.xlu0 %467 }
 0x361   :  { %2120 = vmatprep.subr.bf16.mxu1 %v2119_v20 }
 0x364   :  { %v470_v7 = vpop.permute.xlu1 %469 }
 0x365   :  { %1997 = vmatmul.mubr.msk.f32.vlgmr.msra.gmra.mrb[0].mxu1 %vm298_vm4, %v385_v21 }
 0x366   :  { %2122 = vmatpush3.bf16.msra.mxu1 %v2119_v20  ;;  %2003 = vmatprep.mubr.msk.f32.mxu1 %vm298_vm4, %v468_v22  ;;  %v621_v20 = vmul.f32 %v619_v57, %v2507_v56 }
 0x36d   :  { %2004 = vmatmul.mubr.msk.f32.vlgmr.msra.gmra.mrb[0].mxu1 %vm298_vm4, %v470_v7 }
 0x440   :  { %v2005_v45 = vpop.f32.mrb[0].mxu1 }
 0x441   :  { %v541_v9 = vpop.f32.mrb[1].mxu1  ;;  %v553_v23 = vmul.f32 %v2005_v45, %v2469_v62 }
 0x442   :  { %v552_v24 = vmul.f32 %v2469_v62, %v541_v9 }
 0x443   :  { %556 = vadd.xlane.f32.xlu1 %v553_v23  ;;  %v559_v25 = vmul.f32 %v2005_v45, %v553_v23 }
 0x444   :  { %554 = vadd.xlane.f32.xlu0 %v552_v24  ;;  %v558_v10 = vmul.f32 %v552_v24, %v541_v9 }
 0x448   :  { %560 = vadd.xlane.f32.xlu0 %v558_v10 }
 0x44c   :  { %562 = vadd.xlane.f32.xlu0 %v559_v25 }
 0x4d0   :  { %v557_v29 = vpop.xlane.xlu1 %556 }
 0x4d1   :  { %v555_v27 = vpop.xlane.xlu0 %554  ;;  %v565_v31 = vmul.f32 0.03125, %v557_v29 }
 0x4d2   :  { %v564_v28 = vmul.f32 0.03125, %v555_v27 }
 0x4d3   :  { %v569_v37 = vmul.f32 %v565_v31, %v565_v31 }
 0x4d4   :  { %v568_v32 = vmul.f32 %v564_v28, %v564_v28 }
 0x4d5   :  { %v561_v30 = vpop.xlane.xlu0 %560 }
 0x4d6   :  { %v566_v33 = vmul.f32 0.03125, %v561_v30 }
 0x4d8   :  { %v570_v34 = vsub.f32 %v566_v33, %v568_v32 }
 0x4d9   :  { %v563_v35 = vpop.xlane.xlu0 %562 }
 0x4da   :  { %v572_v38 = vmax.f32 %v570_v34, 0.0  ;;  %v567_v39 = vmul.f32 0.03125, %v563_v35 }
 0x4dc   :  { %v574_v40 = vadd.f32 1e-05, %v572_v38  ;;  %v571_v41 = vsub.f32 %v567_v39, %v569_v37 }
 0x4de   :  { %2260 = vrsqrt.f32 %v574_v40  ;;  %v573_v42 = vmax.f32 %v571_v41, 0.0 }
 0x4e0   :  { %v575_v43 = vadd.f32 1e-05, %v573_v42 }
 0x4e2   :  { %2262 = vrsqrt.f32 %v575_v43  ;;  %v2365_v43 = vmov 12  }
 0x4e8   :  { %v2261_v47 = vpop.eup %2260 }
 0x4e9   :  { %v578_v48 = vmul.f32 %v2261_v47, %v2427_v4 }
 0x4eb   :  { %v580_v49 = vmul.f32 %v578_v48, %v564_v28 }
 0x4ec   :  { %v2263_v50 = vpop.eup %2262 }
 0x4ed   :  { %584 = vrot.lane.b32.xlu1 %v580_v49, %s2355_s7  ;;  %v579_v51 = vmul.f32 %v2263_v50, %v2425_v3 }
 0x4ef   :  { %v581_v52 = vmul.f32 %v579_v51, %v565_v31 }
 0x4f1   :  { %594 = vperm.xlu1 %2243, %v578_v48   ;;  %586 = vrot.lane.b32.xlu0 %v581_v52, %s2355_s7 }
 0x4f5   :  { %599 = vperm.xlu1 %2243, %v579_v51  }
 0x4f9   :  { %2245 = vset.pattern.permute.xlu1 %v2364_v44 }
 0x55f   :  { %v585_v53 = vpop.permute.xlu1 %584 }
 0x560   :  { %v590_v54 = vsub.f32 %v2427_v4, %v585_v53 }
 0x562   :  { %606 = vperm.xlu0 %2244, %v590_v54  }
 0x563   :  { %v587_v55 = vpop.permute.xlu0 %586 }
 0x564   :  { %v591_v58 = vsub.f32 %v2425_v3, %v587_v55 }
 0x566   :  { %636 = vrot.lane.b32.xlu0 %v623_v59, %s2360_s10  ;;  %611 = vperm.xlu1 %2245, %v591_v58  }
 0x567   :  { %2247 = vset.pattern.permute.xlu0 %v2365_v43 }
 0x56a   :  { %634 = vrot.lane.b32.xlu1 %v622_v61, %s2360_s10 }
 0x56b   :  { %2246 = vset.pattern.permute.xlu1 %v2365_v43 }
 0x570   :  { %v595_v63 = vpop.permute.xlu1 %594 }
 0x571   :  { %v602_v0 = vmul.f32 %v595_v63, %v541_v9 }
 0x574   :  { %v600_v2 = vpop.permute.xlu1 %599 }
 0x575   :  { %v603_v8 = vmul.f32 %v2005_v45, %v600_v2 }
 0x5e1   :  { %v607_v5 = vpop.permute.xlu0 %606 }
 0x5e2   :  { %v614_v6 = vadd.f32 %v607_v5, %v602_v0 }
 0x5e4   :  { %v616_v11 = vmax.f32 %v614_v6, 0.0 }
 0x5e5   :  { %v612_v12 = vpop.permute.xlu1 %611  ;;  %v637_v19 = vpop.permute.xlu0 %636 }
 0x5e6   :  { %v615_v13 = vadd.f32 %v612_v12, %v603_v8  ;;  %642 = vrot.lane.b32.xlu1 %v616_v11, %s2355_s7  ;;  %v641_v21 = vadd.f32 %v637_v19, %v621_v20  ;;  %v973_v12 = vld [vmem:[#allocation5 + $0x30] sm:$0xff]  ;;  %v974_v19 = vld [vmem:[#allocation5 + $0x38] sm:$0xff] }
 0x5e8   :  { %v617_v14 = vmax.f32 %v615_v13, 0.0  ;;  %v977_v13 = vmul.f32 %v973_v12, %v2492_v36 }
 0x5e9   :  { %v635_v16 = vpop.permute.xlu1 %634 }
 0x5ea   :  { %644 = vrot.lane.b32.xlu0 %v617_v14, %s2355_s7  ;;  %626 = vrot.lane.b32.xlu1 %v622_v61, %s2361_s11  ;;  %v2127_v46 = vpack.c.bf16 %v617_v14, %v616_v11  ;;  %v640_v18 = vadd.f32 %v635_v16, %v620_v17 }
 0x5ee   :  { %628 = vrot.lane.b32.xlu0 %v623_v59, %s2361_s11  ;;  %737 = vrot.lane.b32.xlu1 %v618_v60, %s2362_s12 }
 0x5f2   :  { %648 = vrot.lane.b32.xlu0 %v616_v11, %s2356_s1  ;;  %650 = vrot.lane.b32.xlu1 %v617_v14, %s2356_s1  ;;  %v2366_v14 = vmov 13  }
 0x5f6   :  { %739 = vrot.lane.b32.xlu0 %v619_v57, %s2362_s12  ;;  %822 = vrot.lane.b32.xlu1 %v640_v18, %s2361_s11 }
 0x5fa   :  { %824 = vrot.lane.b32.xlu0 %v641_v21, %s2361_s11 }
 0x658   :  { %v643_v22 = vpop.permute.xlu1 %642 }
 0x659   :  { %v646_v9 = vmul.f32 %v643_v22, %v2518_v1 }
 0x65c   :  { %v627_v7 = vpop.permute.xlu1 %626  ;;  %v645_v45 = vpop.permute.xlu0 %644 }
 0x65d   :  { %v632_v23 = vadd.f32 %v627_v7, %v620_v17  ;;  %v647_v24 = vmul.f32 %v645_v45, %v2518_v1 }
 0x65f   :  { %v2123_v10 = vpack.c.bf16 %v647_v24, %v646_v9  ;;  %2010 = vmatprep.mubr.msk.f32.mxu1 %vm298_vm4, %v632_v23 }
 0x660   :  { %v738_v25 = vpop.permute.xlu1 %737  ;;  %v629_v26 = vpop.permute.xlu0 %628 }
 0x661   :  { %2124 = vmatprep.subr.bf16.mxu1 %v2123_v10  ;;  %v633_v27 = vadd.f32 %v629_v26, %v621_v20  ;;  %v978_v20 = vmul.f32 %v974_v19, %v2492_v36 }
 0x662   :  { %2126 = vmatpush3.bf16.msra.mxu1 %v2123_v10 }
 0x663   :  { %2128 = vmatprep.subr.bf16.mxu1 %v2127_v46 }
 0x664   :  { %v651_v28 = vpop.permute.xlu1 %650  ;;  %v649_v29 = vpop.permute.xlu0 %648 }
 0x665   :  { %v653_v30 = vmul.f32 %v651_v28, %v2525_v15  ;;  %v652_v31 = vmul.f32 %v649_v29, %v2525_v15  ;;  %2011 = vmatmul.mubr.msk.f32.vlgmr.msra.gmra.mrb[2].mxu1 %vm298_vm4, %v633_v27  ;;  %v975_v29 = vmul.f32 %v973_v12, %v2507_v56 }
 0x666   :  { %2130 = vmatpush3.bf16.msra.mxu1 %v2127_v46  ;;  %2017 = vmatprep.mubr.msk.f32.mxu1 %vm298_vm4, %v738_v25 }
 0x667   :  { %v2131_v32 = vpack.c.bf16 %v653_v30, %v652_v31 }
 0x668   :  { %v740_v33 = vpop.permute.xlu0 %739  ;;  %v823_v34 = vpop.permute.xlu1 %822 }
 0x669   :  { %2132 = vmatprep.subr.bf16.mxu1 %v2131_v32 }
 0x66c   :  { %v825_v35 = vpop.permute.xlu0 %824 }
 0x66d   :  { %2018 = vmatmul.mubr.msk.f32.vlgmr.msra.gmra.mrb[2].mxu1 %vm298_vm4, %v740_v33 }
 0x66e   :  { %2134 = vmatpush3.bf16.msra.mxu1 %v2131_v32  ;;  %2024 = vmatprep.mubr.msk.f32.mxu1 %vm298_vm4, %v823_v34  ;;  %v976_v32 = vmul.f32 %v974_v19, %v2507_v56 }
 0x675   :  { %2025 = vmatmul.mubr.msk.f32.vlgmr.msra.gmra.mrb[2].mxu1 %vm298_vm4, %v825_v35 }
 0x748   :  { %v2026_v37 = vpop.f32.mrb[2].mxu1 }
 0x749   :  { %v896_v38 = vpop.f32.mrb[3].mxu1  ;;  %v908_v39 = vmul.f32 %v2026_v37, %v2469_v62 }
 0x74a   :  { %v907_v40 = vmul.f32 %v2469_v62, %v896_v38 }
 0x74b   :  { %911 = vadd.xlane.f32.xlu0 %v908_v39  ;;  %v914_v42 = vmul.f32 %v2026_v37, %v908_v39 }
 0x74c   :  { %909 = vadd.xlane.f32.xlu1 %v907_v40  ;;  %v913_v41 = vmul.f32 %v907_v40, %v896_v38 }
 0x74f   :  { %915 = vadd.xlane.f32.xlu0 %v913_v41 }
 0x750   :  { %917 = vadd.xlane.f32.xlu1 %v914_v42 }
 0x7d8   :  { %v912_v44 = vpop.xlane.xlu0 %911 }
 0x7d9   :  { %v910_v47 = vpop.xlane.xlu1 %909  ;;  %v920_v48 = vmul.f32 0.03125, %v912_v44 }
 0x7da   :  { %v919_v49 = vmul.f32 0.03125, %v910_v47 }
 0x7db   :  { %v924_v54 = vmul.f32 %v920_v48, %v920_v48 }
 0x7dc   :  { %v923_v50 = vmul.f32 %v919_v49, %v919_v49  ;;  %v916_v51 = vpop.xlane.xlu0 %915 }
 0x7dd   :  { %v921_v52 = vmul.f32 0.03125, %v916_v51  ;;  %v918_v53 = vpop.xlane.xlu1 %917 }
 0x7de   :  { %v922_v55 = vmul.f32 0.03125, %v918_v53 }
 0x7df   :  { %v925_v57 = vsub.f32 %v921_v52, %v923_v50 }
 0x7e0   :  { %v926_v58 = vsub.f32 %v922_v55, %v924_v54 }
 0x7e1   :  { %v927_v59 = vmax.f32 %v925_v57, 0.0 }
 0x7e2   :  { %v928_v60 = vmax.f32 %v926_v58, 0.0 }
 0x7e3   :  { %v929_v61 = vadd.f32 1e-05, %v927_v59 }
 0x7e4   :  { %v930_v63 = vadd.f32 1e-05, %v928_v60 }
 0x7e5   :  { %2264 = vrsqrt.f32 %v929_v61 }
 0x7e6   :  { %2266 = vrsqrt.f32 %v930_v63  ;;  %v2367_v63 = vmov 14  }
 0x7ef   :  { %v2265_v0 = vpop.eup %2264 }
 0x7f0   :  { %v2267_v2 = vpop.eup %2266  ;;  %v933_v5 = vmul.f32 %v2265_v0, %v2427_v4 }
 0x7f1   :  { %v934_v6 = vmul.f32 %v2267_v2, %v2425_v3 }
 0x7f2   :  { %v935_v8 = vmul.f32 %v933_v5, %v919_v49 }
 0x7f3   :  { %v936_v11 = vmul.f32 %v934_v6, %v920_v48 }
 0x7f4   :  { %939 = vrot.lane.b32.xlu0 %v935_v8, %s2355_s7 }
 0x7f5   :  { %941 = vrot.lane.b32.xlu1 %v936_v11, %s2355_s7 }
 0x7f8   :  { %954 = vperm.xlu0 %2247, %v934_v6  }
 0x7f9   :  { %949 = vperm.xlu1 %2246, %v933_v5  }
 0x7fc   :  { %989 = vrot.lane.b32.xlu0 %v977_v13, %s2360_s10 }
 0x7fd   :  { %2248 = vset.pattern.permute.xlu1 %v2366_v14 }
 0x866   :  { %v940_v46 = vpop.permute.xlu0 %939 }
 0x867   :  { %v945_v16 = vsub.f32 %v2427_v4, %v940_v46  ;;  %v942_v17 = vpop.permute.xlu1 %941 }
 0x868   :  { %v946_v18 = vsub.f32 %v2425_v3, %v942_v17 }
 0x869   :  { %961 = vperm.xlu1 %2248, %v945_v16  }
 0x86d   :  { %966 = vperm.xlu1 %2248, %v946_v18  }
 0x871   :  { %991 = vrot.lane.b32.xlu1 %v978_v20, %s2360_s10 }
 0x872   :  { %2249 = vset.pattern.permute.xlu1 %v2367_v63 }
 0x877   :  { %v955_v7 = vpop.permute.xlu0 %954 }
 0x878   :  { %v950_v21 = vpop.permute.xlu1 %949  ;;  %v958_v23 = vmul.f32 %v2026_v37, %v955_v7 }
 0x879   :  { %v957_v22 = vmul.f32 %v950_v21, %v896_v38 }
 0x87b   :  { %v990_v28 = vpop.permute.xlu0 %989 }
 0x87c   :  { %v995_v30 = vadd.f32 %v990_v28, %v975_v29  ;;  %v1329_v28 = vld [vmem:[#allocation5 + $0x48] sm:$0xff] }
 0x8e8   :  { %v962_v45 = vpop.permute.xlu1 %961 }
 0x8e9   :  { %v969_v9 = vadd.f32 %v962_v45, %v957_v22  ;;  %v2368_v22 = vmov 15  }
 0x8ea   :  { %2250 = vset.pattern.permute.xlu0 %v2368_v22 }
 0x8eb   :  { %v971_v24 = vmax.f32 %v969_v9, 0.0 }
 0x8ec   :  { %v967_v10 = vpop.permute.xlu1 %966 }
 0x8ed   :  { %v970_v25 = vadd.f32 %v967_v10, %v958_v23  ;;  %997 = vrot.lane.b32.xlu0 %v971_v24, %s2355_s7 }
 0x8ef   :  { %v972_v26 = vmax.f32 %v970_v25, 0.0 }
 0x8f0   :  { %v992_v31 = vpop.permute.xlu1 %991 }
 0x8f1   :  { %981 = vrot.lane.b32.xlu0 %v977_v13, %s2361_s11  ;;  %999 = vrot.lane.b32.xlu1 %v972_v26, %s2355_s7  ;;  %v2139_v27 = vpack.c.bf16 %v972_v26, %v971_v24  ;;  %v996_v33 = vadd.f32 %v992_v31, %v976_v32  ;;  %v1328_v31 = vld [vmem:[#allocation5 + $0x40] sm:$0xff] }
 0x8f5   :  { %1092 = vrot.lane.b32.xlu0 %v973_v12, %s2362_s12  ;;  %983 = vrot.lane.b32.xlu1 %v978_v20, %s2361_s11 }
 0x8f9   :  { %1005 = vrot.lane.b32.xlu0 %v972_v26, %s2356_s1  ;;  %1003 = vrot.lane.b32.xlu1 %v971_v24, %s2356_s1 }
 0x8fd   :  { %1094 = vrot.lane.b32.xlu1 %v974_v19, %s2362_s12  ;;  %1177 = vrot.lane.b32.xlu0 %v995_v30, %s2361_s11  ;;  %v1333_v30 = vmul.f32 %v1329_v28, %v2492_v36 }
 0x901   :  { %1179 = vrot.lane.b32.xlu1 %v996_v33, %s2361_s11 }
 0x95f   :  { %v998_v34 = vpop.permute.xlu0 %997 }
 0x960   :  { %v1001_v38 = vmul.f32 %v998_v34, %v2518_v1 }
 0x963   :  { %v1000_v35 = vpop.permute.xlu1 %999  ;;  %v982_v37 = vpop.permute.xlu0 %981 }
 0x964   :  { %v1002_v39 = vmul.f32 %v1000_v35, %v2518_v1  ;;  %v987_v40 = vadd.f32 %v982_v37, %v975_v29 }
 0x966   :  { %2031 = vmatprep.mubr.msk.f32.mxu0 %vm298_vm4, %v987_v40  ;;  %v2135_v41 = vpack.c.bf16 %v1002_v39, %v1001_v38 }
 0x967   :  { %v984_v42 = vpop.permute.xlu1 %983  ;;  %v1093_v43 = vpop.permute.xlu0 %1092 }
 0x968   :  { %2136 = vmatprep.subr.bf16.mxu0 %v2135_v41  ;;  %v988_v44 = vadd.f32 %v984_v42, %v976_v32  ;;  %v1332_v32 = vmul.f32 %v1328_v31, %v2492_v36 }
 0x969   :  { %2138 = vmatpush3.bf16.msra.mxu0 %v2135_v41 }
 0x96a   :  { %2140 = vmatprep.subr.bf16.mxu0 %v2139_v27 }
 0x96b   :  { %v1004_v47 = vpop.permute.xlu1 %1003  ;;  %v1006_v48 = vpop.permute.xlu0 %1005 }
 0x96c   :  { %v1007_v49 = vmul.f32 %v1004_v47, %v2525_v15  ;;  %v1008_v50 = vmul.f32 %v1006_v48, %v2525_v15  ;;  %2032 = vmatmul.mubr.msk.f32.vlgmr.msra.gmra.mrb[0].mxu0 %vm298_vm4, %v988_v44  ;;  %v1331_v48 = vmul.f32 %v1329_v28, %v2507_v56 }
 0x96d   :  { %2142 = vmatpush3.bf16.msra.mxu0 %v2139_v27  ;;  %2038 = vmatprep.mubr.msk.f32.mxu0 %vm298_vm4, %v1093_v43  ;;  %v1330_v43 = vmul.f32 %v1328_v31, %v2507_v56 }
 0x96e   :  { %v2143_v51 = vpack.c.bf16 %v1008_v50, %v1007_v49 }
 0x96f   :  { %v1095_v52 = vpop.permute.xlu1 %1094  ;;  %v1178_v53 = vpop.permute.xlu0 %1177 }
 0x970   :  { %2144 = vmatprep.subr.bf16.mxu0 %v2143_v51 }
 0x973   :  { %v1180_v54 = vpop.permute.xlu1 %1179 }
 0x974   :  { %2039 = vmatmul.mubr.msk.f32.vlgmr.msra.gmra.mrb[0].mxu0 %vm298_vm4, %v1095_v52 }
 0x975   :  { %2146 = vmatpush3.bf16.msra.mxu0 %v2143_v51  ;;  %2045 = vmatprep.mubr.msk.f32.mxu0 %vm298_vm4, %v1178_v53 }
 0x97c   :  { %2046 = vmatmul.mubr.msk.f32.vlgmr.msra.gmra.mrb[0].mxu0 %vm298_vm4, %v1180_v54 }
 0xa4f   :  { %v2047_v55 = vpop.f32.mrb[0].mxu0 }
 0xa50   :  { %v1251_v57 = vpop.f32.mrb[1].mxu0  ;;  %v1263_v58 = vmul.f32 %v2047_v55, %v2469_v62 }
 0xa51   :  { %v1262_v59 = vmul.f32 %v2469_v62, %v1251_v57 }
 0xa52   :  { %1266 = vadd.xlane.f32.xlu1 %v1263_v58  ;;  %v1269_v61 = vmul.f32 %v2047_v55, %v1263_v58 }
 0xa53   :  { %1264 = vadd.xlane.f32.xlu0 %v1262_v59  ;;  %v1268_v60 = vmul.f32 %v1262_v59, %v1251_v57 }
 0xa57   :  { %1270 = vadd.xlane.f32.xlu0 %v1268_v60 }
 0xa5b   :  { %1272 = vadd.xlane.f32.xlu0 %v1269_v61 }
 0xadf   :  { %v1267_v5 = vpop.xlane.xlu1 %1266 }
 0xae0   :  { %v1265_v0 = vpop.xlane.xlu0 %1264  ;;  %v1275_v8 = vmul.f32 0.03125, %v1267_v5 }
 0xae1   :  { %v1274_v2 = vmul.f32 0.03125, %v1265_v0 }
 0xae2   :  { %v1279_v46 = vmul.f32 %v1275_v8, %v1275_v8 }
 0xae3   :  { %v1278_v11 = vmul.f32 %v1274_v2, %v1274_v2 }
 0xae4   :  { %v1271_v6 = vpop.xlane.xlu0 %1270 }
 0xae5   :  { %v1276_v12 = vmul.f32 0.03125, %v1271_v6 }
 0xae7   :  { %v1280_v13 = vsub.f32 %v1276_v12, %v1278_v11 }
 0xae8   :  { %v1273_v14 = vpop.xlane.xlu0 %1272 }
 0xae9   :  { %v1282_v16 = vmax.f32 %v1280_v13, 0.0  ;;  %v1277_v17 = vmul.f32 0.03125, %v1273_v14 }
 0xaeb   :  { %v1284_v18 = vadd.f32 1e-05, %v1282_v16  ;;  %v1281_v19 = vsub.f32 %v1277_v17, %v1279_v46  ;;  %v2369_v46 = vmov 16  }
 0xaed   :  { %2268 = vrsqrt.f32 %v1284_v18  ;;  %v1283_v20 = vmax.f32 %v1281_v19, 0.0 }
 0xaef   :  { %v1285_v21 = vadd.f32 1e-05, %v1283_v20 }
 0xaf1   :  { %2270 = vrsqrt.f32 %v1285_v21 }
 0xaf7   :  { %v2269_v7 = vpop.eup %2268 }
 0xaf8   :  { %v1288_v45 = vmul.f32 %v2269_v7, %v2427_v4 }
 0xafa   :  { %v1290_v9 = vmul.f32 %v1288_v45, %v1274_v2 }
 0xafb   :  { %v2271_v23 = vpop.eup %2270 }
 0xafc   :  { %1294 = vrot.lane.b32.xlu1 %v1290_v9, %s2355_s7  ;;  %v1289_v24 = vmul.f32 %v2271_v23, %v2425_v3 }
 0xafe   :  { %v1291_v10 = vmul.f32 %v1289_v24, %v1275_v8 }
 0xb00   :  { %1304 = vperm.xlu1 %2249, %v1288_v45   ;;  %1296 = vrot.lane.b32.xlu0 %v1291_v10, %s2355_s7 }
 0xb04   :  { %1309 = vperm.xlu1 %2249, %v1289_v24  }
 0xb08   :  { %2251 = vset.pattern.permute.xlu1 %v2368_v22 }
 0xb6e   :  { %v1295_v25 = vpop.permute.xlu1 %1294 }
 0xb6f   :  { %v1300_v26 = vsub.f32 %v2427_v4, %v1295_v25 }
 0xb71   :  { %1316 = vperm.xlu0 %2250, %v1300_v26  }
 0xb72   :  { %v1297_v27 = vpop.permute.xlu0 %1296 }
 0xb73   :  { %v1301_v29 = vsub.f32 %v2425_v3, %v1297_v27  ;;  %v1774_v27 = vld [vmem:[#allocation5 + $0x50] sm:$0xff] }
 0xb75   :  { %1346 = vrot.lane.b32.xlu0 %v1333_v30, %s2360_s10  ;;  %1321 = vperm.xlu1 %2251, %v1301_v29  }
 0xb76   :  { %2253 = vset.pattern.permute.xlu0 %v2369_v46 }
 0xb79   :  { %1344 = vrot.lane.b32.xlu1 %v1332_v32, %s2360_s10 }
 0xb7a   :  { %2252 = vset.pattern.permute.xlu1 %v2369_v46 }
 0xb7f   :  { %v1305_v33 = vpop.permute.xlu1 %1304 }
 0xb80   :  { %v1312_v34 = vmul.f32 %v1305_v33, %v1251_v57 }
 0xb83   :  { %v1310_v35 = vpop.permute.xlu1 %1309 }
 0xb84   :  { %v1313_v38 = vmul.f32 %v2047_v55, %v1310_v35 }
 0xbf0   :  { %v1317_v37 = vpop.permute.xlu0 %1316 }
 0xbf1   :  { %v1324_v4 = vadd.f32 %v1317_v37, %v1312_v34  ;;  %v1683_v37 = vld [vmem:[#allocation5 + $0x60] sm:$0xff] }
 0xbf3   :  { %v1326_v39 = vmax.f32 %v1324_v4, 0.0  ;;  %v1684_v4 = vld [vmem:[#allocation5 + $0x68] sm:$0xff] }
 0xbf4   :  { %v1322_v40 = vpop.permute.xlu1 %1321  ;;  %v1347_v47 = vpop.permute.xlu0 %1346 }
 0xbf5   :  { %v1325_v41 = vadd.f32 %v1322_v40, %v1313_v38  ;;  %1352 = vrot.lane.b32.xlu1 %v1326_v39, %s2355_s7  ;;  %v1351_v49 = vadd.f32 %v1347_v47, %v1331_v48  ;;  %v1685_v38 = vld [vmem:[#allocation5 + $0x70] sm:$0xff]  ;;  %v1686_v40 = vld [vmem:[#allocation5 + $0x78] sm:$0xff] }
 0xbf6   :  { %v1690_v47 = vld [vmem:[#allocation5 + $0x98] sm:$0xff] }
 0xbf7   :  { %v1327_v3 = vmax.f32 %v1325_v41, 0.0  ;;  %v2163_v41 = vpack.c.bf16 %v1686_v40, %v1685_v38 }
 0xbf8   :  { %v1345_v36 = vpop.permute.xlu1 %1344 }
 0xbf9   :  { %1354 = vrot.lane.b32.xlu0 %v1327_v3, %s2355_s7  ;;  %1336 = vrot.lane.b32.xlu1 %v1332_v32, %s2361_s11  ;;  %v2151_v42 = vpack.c.bf16 %v1327_v3, %v1326_v39  ;;  %v1350_v44 = vadd.f32 %v1345_v36, %v1330_v43  ;;  %v2277_v32 = vld [vmem:[#allocation5 + $0x8] sm:$0xff]  ;;  %v2370_v36 = vmov 17  }
 0xbfd   :  { %1338 = vrot.lane.b32.xlu0 %v1333_v30, %s2361_s11  ;;  %1447 = vrot.lane.b32.xlu1 %v1328_v31, %s2362_s12  ;;  %v2276_v30 = vld [vmem:[#allocation5] sm:$0xff] }
 0xc01   :  { %1358 = vrot.lane.b32.xlu0 %v1326_v39, %s2356_s1  ;;  %1360 = vrot.lane.b32.xlu1 %v1327_v3, %s2356_s1  ;;  %v2159_v39 = vpack.c.bf16 %v1684_v4, %v1683_v37  ;;  %v1687_v3 = vld [vmem:[#allocation5 + $0x80] sm:$0xff] }
 0xc03   :  { %2160 = vmatprep.subr.bf16.mxu0 %v2159_v39 }
 0xc04   :  { %2162 = vmatpush3.bf16.msra.mxu0 %v2159_v39 }
 0xc05   :  { %1449 = vrot.lane.b32.xlu0 %v1329_v28, %s2362_s12  ;;  %1532 = vrot.lane.b32.xlu1 %v1350_v44, %s2361_s11  ;;  %v1689_v44 = vld [vmem:[#allocation5 + $0x90] sm:$0xff] }
 0xc06   :  { %2164 = vmatprep.subr.bf16.mxu0 %v2163_v41 }
 0xc08   :  { %2166 = vmatpush3.bf16.msra.mxu0 %v2163_v41 }
 0xc09   :  { %1534 = vrot.lane.b32.xlu0 %v1351_v49, %s2361_s11  ;;  %v1691_v49 = vld [vmem:[#allocation5 + $0xa0] sm:$0xff] }
 0xc67   :  { %v1353_v50 = vpop.permute.xlu1 %1352 }
 0xc68   :  { %v1356_v53 = vmul.f32 %v1353_v50, %v2518_v1  ;;  %v1692_v50 = vld [vmem:[#allocation5 + $0xa8] sm:$0xff] }
 0xc6b   :  { %v1337_v51 = vpop.permute.xlu1 %1336  ;;  %v1355_v52 = vpop.permute.xlu0 %1354 }
 0xc6c   :  { %v1342_v54 = vadd.f32 %v1337_v51, %v1330_v43  ;;  %v1357_v55 = vmul.f32 %v1355_v52, %v2518_v1  ;;  %v2175_v51 = vpack.c.bf16 %v1692_v50, %v1691_v49  ;;  %v1693_v52 = vld [vmem:[#allocation5 + $0xb0] sm:$0xff] }
 0xc6e   :  { %v2147_v57 = vpack.c.bf16 %v1357_v55, %v1356_v53  ;;  %2052 = vmatprep.mubr.msk.f32.mxu1 %vm298_vm4, %v1342_v54  ;;  %v1694_v53 = vld [vmem:[#allocation5 + $0xb8] sm:$0xff] }
 0xc6f   :  { %v1448_v58 = vpop.permute.xlu1 %1447  ;;  %v1339_v56 = vpop.permute.xlu0 %1338  ;;  %v2179_v54 = vpack.c.bf16 %v1694_v53, %v1693_v52 }
 0xc70   :  { %2148 = vmatprep.subr.bf16.mxu1 %v2147_v57  ;;  %v1343_v59 = vadd.f32 %v1339_v56, %v1331_v48  ;;  %v2171_v48 = vpack.c.bf16 %v1690_v47, %v1689_v44  ;;  %v1696_v56 = vld [vmem:[#allocation5 + $0xc8] sm:$0xff] }
 0xc71   :  { %2150 = vmatpush3.bf16.msra.mxu1 %v2147_v57 }
 0xc72   :  { %2152 = vmatprep.subr.bf16.mxu1 %v2151_v42 }
 0xc73   :  { %v1361_v60 = vpop.permute.xlu1 %1360  ;;  %v1359_v61 = vpop.permute.xlu0 %1358 }
 0xc74   :  { %v1363_v63 = vmul.f32 %v1361_v60, %v2525_v15  ;;  %v1362_v0 = vmul.f32 %v1359_v61, %v2525_v15  ;;  %2053 = vmatmul.mubr.msk.f32.vlgmr.msra.gmra.mrb[4].mxu1 %vm298_vm4, %v1343_v59 }
 0xc75   :  { %2154 = vmatpush3.bf16.msra.mxu1 %v2151_v42  ;;  %2059 = vmatprep.mubr.msk.f32.mxu1 %vm298_vm4, %v1448_v58  ;;  %v1688_v42 = vld [vmem:[#allocation5 + $0x88] sm:$0xff]  ;;  %v1695_v58 = vld [vmem:[#allocation5 + $0xc0] sm:$0xff] }
 0xc76   :  { %v2155_v1 = vpack.c.bf16 %v1363_v63, %v1362_v0  ;;  %v2167_v43 = vpack.c.bf16 %v1688_v42, %v1687_v3  ;;  %v2183_v60 = vpack.c.bf16 %v1696_v56, %v1695_v58  ;;  %v1697_v63 = vld [vmem:[#allocation5 + $0xd0] sm:$0xff]  ;;  %v1698_v0 = vld [vmem:[#allocation5 + $0xd8] sm:$0xff] }
 0xc77   :  { %v1450_v2 = vpop.permute.xlu0 %1449  ;;  %v1533_v5 = vpop.permute.xlu1 %1532 }
 0xc78   :  { %2156 = vmatprep.subr.bf16.mxu1 %v2155_v1  ;;  %2168 = vmatprep.subr.bf16.mxu0 %v2167_v43 }
 0xc79   :  { %2170 = vmatpush3.bf16.msra.mxu0 %v2167_v43 }
 0xc7a   :  { %2172 = vmatprep.subr.bf16.mxu0 %v2171_v48 }
 0xc7b   :  { %v1535_v6 = vpop.permute.xlu0 %1534 }
 0xc7c   :  { %2060 = vmatmul.mubr.msk.f32.vlgmr.msra.gmra.mrb[4].mxu1 %vm298_vm4, %v1450_v2 }
 0xc7d   :  { %2158 = vmatpush3.bf16.msra.mxu1 %v2155_v1  ;;  %2066 = vmatprep.mubr.msk.f32.mxu1 %vm298_vm4, %v1533_v5  ;;  %v2187_v1 = vpack.c.bf16 %v1698_v0, %v1697_v63 }
 0xc7e   :  { %2174 = vmatpush3.bf16.msra.mxu0 %v2171_v48 }
 0xc7f   :  { %2176 = vmatprep.subr.bf16.mxu0 %v2175_v51 }
 0xc82   :  { %2178 = vmatpush3.bf16.msra.mxu0 %v2175_v51 }
 0xc83   :  { %2180 = vmatprep.subr.bf16.mxu0 %v2179_v54 }
 0xc84   :  { %2067 = vmatmul.mubr.msk.f32.vlgmr.msra.gmra.mrb[4].mxu1 %vm298_vm4, %v1535_v6 }
 0xc85   :  { %2108 = vmatprep.mubr.msk.f32.mxu1 %vm298_vm4, %v1774_v27 }
 0xc86   :  { %2182 = vmatpush3.bf16.msra.mxu0 %v2179_v54 }
 0xc87   :  { %2184 = vmatprep.subr.bf16.mxu0 %v2183_v60 }
 0xc8a   :  { %2186 = vmatpush3.bf16.msra.mxu0 %v2183_v60 }
 0xc8b   :  { %2188 = vmatprep.subr.bf16.mxu0 %v2187_v1 }
 0xc8e   :  { %2190 = vmatpush3.bf16.msra.mxu0 %v2187_v1 }
 0xd57   :  { %v2636_v8 = vpop.f32.mrb[4].mxu1 }
 0xd58   :  { %v1618_v15 = vmul.f32 %v2636_v8, %v2469_v62  ;;  %v2640_v11 = vpop.f32.mrb[5].mxu1 }
 0xd59   :  { %v1617_v12 = vmul.f32 %v2469_v62, %v2640_v11 }
 0xd5a   :  { %1621 = vadd.xlane.f32.xlu0 %v1618_v15  ;;  %v1624_v14 = vmul.f32 %v2636_v8, %v1618_v15 }
 0xd5b   :  { %v1623_v13 = vmul.f32 %v1617_v12, %v2640_v11  ;;  %1619 = vadd.xlane.f32.xlu1 %v1617_v12 }
 0xd5e   :  { %1625 = vadd.xlane.f32.xlu0 %v1623_v13 }
 0xd5f   :  { %1627 = vadd.xlane.f32.xlu1 %v1624_v14 }
 0xde7   :  { %v1622_v16 = vpop.xlane.xlu0 %1621 }
 0xde8   :  { %v1620_v17 = vpop.xlane.xlu1 %1619  ;;  %v1630_v18 = vmul.f32 0.03125, %v1622_v16 }
 0xde9   :  { %v1629_v19 = vmul.f32 0.03125, %v1620_v17 }
 0xdea   :  { %v1634_v7 = vmul.f32 %v1630_v18, %v1630_v18 }
 0xdeb   :  { %v1633_v20 = vmul.f32 %v1629_v19, %v1629_v19  ;;  %v1626_v21 = vpop.xlane.xlu0 %1625 }
 0xdec   :  { %v1631_v62 = vmul.f32 0.03125, %v1626_v21  ;;  %v1628_v22 = vpop.xlane.xlu1 %1627 }
 0xded   :  { %v1632_v45 = vmul.f32 0.03125, %v1628_v22 }
 0xdee   :  { %v1635_v9 = vsub.f32 %v1631_v62, %v1633_v20 }
 0xdef   :  { %v1636_v23 = vsub.f32 %v1632_v45, %v1634_v7 }
 0xdf0   :  { %v1637_v24 = vmax.f32 %v1635_v9, 0.0 }
 0xdf1   :  { %v1638_v10 = vmax.f32 %v1636_v23, 0.0 }
 0xdf2   :  { %v1639_v25 = vadd.f32 1e-05, %v1637_v24 }
 0xdf3   :  { %v1640_v26 = vadd.f32 1e-05, %v1638_v10 }
 0xdf4   :  { %2272 = vrsqrt.f32 %v1639_v25 }
 0xdf5   :  { %2274 = vrsqrt.f32 %v1640_v26 }
 0xdfe   :  { %v2273_v28 = vpop.eup %2272 }
 0xdff   :  { %v2275_v29 = vpop.eup %2274  ;;  %v1643_v31 = vmul.f32 %v2276_v30, %v2273_v28 }
 0xe00   :  { %v1644_v33 = vmul.f32 %v2277_v32, %v2275_v29 }
 0xe01   :  { %v1645_v34 = vmul.f32 %v1643_v31, %v1629_v19  ;;  %v1775_v19 = vld [vmem:[#allocation5 + $0x58] sm:$0x1] }
 0xe02   :  { %v1646_v35 = vmul.f32 %v1644_v33, %v1630_v18 }
 0xe03   :  { %1649 = vrot.lane.b32.xlu0 %v1645_v34, %s2355_s7 }
 0xe04   :  { %1651 = vrot.lane.b32.xlu1 %v1646_v35, %s2355_s7 }
 0xe07   :  { %1664 = vperm.xlu0 %2253, %v1644_v33  }
 0xe08   :  { %1659 = vperm.xlu1 %2252, %v1643_v31  }
 0xe0b   :  { %1778 = vperm.xlu0 %2253, %v1774_v27  }
 0xe0c   :  { %2254 = vset.pattern.permute.xlu1 %v2370_v36 }
 0xe75   :  { %v1650_v55 = vpop.permute.xlu0 %1649 }
 0xe76   :  { %v1655_v57 = vsub.f32 %v2276_v30, %v1650_v55  ;;  %v1652_v59 = vpop.permute.xlu1 %1651 }
 0xe77   :  { %v1656_v61 = vsub.f32 %v2277_v32, %v1652_v59 }
 0xe78   :  { %1671 = vperm.xlu1 %2254, %v1655_v57  }
 0xe7c   :  { %1676 = vperm.xlu1 %2254, %v1656_v61  }
 0xe80   :  { %2255 = vset.pattern.permute.xlu1 %v2369_v46 }
 0xe81   :  { %1783 = vperm.xlu1 %2255, %v1775_v19  }
 0xe86   :  { %v1665_v6 = vpop.permute.xlu0 %1664 }
 0xe87   :  { %v1660_v2 = vpop.permute.xlu1 %1659  ;;  %v1668_v13 = vmul.f32 %v2636_v8, %v1665_v6 }
 0xe88   :  { %v1667_v5 = vmul.f32 %v1660_v2, %v2640_v11 }
 0xe8a   :  { %v1779_v8 = vpop.permute.xlu0 %1778 }
 0xef7   :  { %v1672_v15 = vpop.permute.xlu1 %1671 }
 0xef8   :  { %v1679_v12 = vadd.f32 %v1672_v15, %v1667_v5 }
 0xefa   :  { %v1681_v14 = vmax.f32 %v1679_v12, 0.0 }
 0xefb   :  { %v1677_v16 = vpop.permute.xlu1 %1676 }
 0xefc   :  { %v1680_v17 = vadd.f32 %v1677_v16, %v1668_v13  ;;  %2101 = vmatprep.mubr.f32.mxu0 %v1681_v14 }
 0xefe   :  { %v1682_v18 = vmax.f32 %v1680_v17, 0.0 }
 0xf00   :  { %2102 = vmatmul.mubr.f32.vlgmr.msra.gmra.mrb[2].mxu0 %v1682_v18  ;;  %v1784_v11 = vpop.permute.xlu1 %1783 }
 0xfd3   :  { %v2103_v20 = vpop.f32.mrb[2].mxu0 }
 0xfd4   :  { %v1765_v21 = vpop.f32.mrb[3].mxu0 }
 0xfd5   :  { %v2191_v62 = vpack.c.bf16 %v2103_v20, %v1765_v21 }
 0xfd7   :  { %2192 = vmatprep.subr.bf16.mxu1 %v2191_v62 }
 0xfd8   :  { %2194 = vmatpush3.bf16.msra.mxu1 %v2191_v62 }
 0xfdb   :  { %2109 = vmatmul.mubr.msk.f32.vlgmr.msra.gmra.mrb[6].mxu1 %vm298_vm4, %v1775_v19 }
0x10ae   :  { %v2110_v46 = vpop.f32.mrb[6].mxu1 }
0x10af   :  { %v1862_v22 = vadd.f32 %v2110_v46, %v1784_v11  ;;  %v1856_v7 = vpop.f32.mrb[7].mxu1 }
0x10b0   :  { %v1857_v45 = vadd.f32 %v1856_v7, %v1779_v8 }
0x10b1   :  { %1866 = vst [vmem:[#allocation7 + $0x8] sm:$0x1] %v1862_v22 }
0x10b2   :  { %1865 = vst [vmem:[#allocation7] sm:$0xff] %v1857_v45 }
0x10b3   :  { %2333 = shalt.err (!%p2330_p6)
}
0x10b4   :  { %s2334_s18 = scalar_lea.hbm %s2672_s2, 256 }
0x10b5   :  { %p2335_p7 = scmp.ne.s32.totalorder %s2672_s2, %s2334_s18  ;;  %p2338_p8 = scmp.lt.u32.totalorder %s2334_s18, %s2672_s2 }
0x10b7   :  { %p2340_p9 = pnand %p2338_p8, %p2335_p7 }
0x10b9   :  { %2343 = shalt.err (!%p2340_p9)
}
0x10ba   :  { %1878 = dma.vmem_to_hbm [thread:$0]  %s1873_s14, 256, %s2672_s2, [#allocation4], %s2352_s0, %s2352_s0, %s2353_s4  }
0x10bb   :  { %2348 = dma.done.wait [#allocation4], 256  }
0x10bc   :  { %2349 = vsyncadd [#allocation4], 4294967040 }
0x10bd   :  { %1882 = vsyncpa [#allocation3], 1 }
0x10be   :  { %1883 = vsyncpa [#allocation6], 1 }
0x10bf   :  { %1884 = vsyncpa [#allocation4], 1 }

</bundles_post_ra>
